<compile_context>
chip_gen: v5e
topology: v5e:2x2
jax: 0.10.0
libtpu: 0.0.40
codegen_flags: <defaults>
</compile_context>

<pallas_src>
import jax
import jax.numpy as jnp
from jax.experimental import pallas as pl
from jax.experimental.pallas import tpu as pltpu

EPS = 1e-5  # PyTorch BatchNorm2d default eps


def _resblock_kernel(x_ref, w_ref, cb_ref, g_ref, be_ref, p_ref,
                     mtop_ref, mbot_ref, o_ref):
    f32 = jnp.float32

    x_in = x_ref[...]           # (NH, WC) f32, lane-dense
    p = p_ref[...]              # (WC, WC) channel-pooling matrix (includes 1/NHW)
    m_top = mtop_ref[...]       # (NH, WC) mask: 0 on rows with h == 0
    m_bot = mbot_ref[...]       # (NH, WC) mask: 0 on rows with h == H-1
    nh = x_in.shape[0]

    def bn(x, i):
        # BatchNorm2d, training mode: biased batch statistics over (N, H, W).
        # Reduce over rows first (cross-sublane reduce), then pool the
        # interleaved W*C lanes per channel with one tiny matmul.
        # TODO(synk): running_mean/running_var updates (training side effect)
        # are not materialized; they do not affect the forward output.
        row_sum = jnp.sum(x, axis=0, keepdims=True)                      # (1, WC)
        mean = jnp.dot(row_sum, p, preferred_element_type=f32)           # (1, WC)
        xc = x - mean
        sq_sum = jnp.sum(xc * xc, axis=0, keepdims=True)                 # (1, WC)
        var = jnp.dot(sq_sum, p, preferred_element_type=f32)             # (1, WC)
        inv = jax.lax.rsqrt(var + EPS)
        return xc * (inv * g_ref[i]) + be_ref[i]

    def conv3x3_relu(x, i):
        # kh (row) taps as XLU sublane rotations + H-border (and batch-edge)
        # zero masks; kw taps + W-border zero padding are folded into the
        # block-banded weight matrix w_ref[i], so the conv is one MXU matmul.
        x_m1 = pltpu.roll(x, 1, axis=0) * m_top                          # x at h-1
        x_p1 = pltpu.roll(x, nh - 1, axis=0) * m_bot                     # x at h+1
        patches = jnp.concatenate([x_m1, x, x_p1], axis=1)               # (NH, 3*WC)
        y = jnp.dot(patches, w_ref[i], preferred_element_type=f32) + cb_ref[i]
        return jnp.maximum(y, 0.0)

    x = bn(x_in, 0)                 # bn1
    x = conv3x3_relu(x, 0)          # conv_1 + relu
    x = conv3x3_relu(x, 1)          # conv_2 + relu
    x = bn(x, 1) + x_in             # bn2 + residual
    x = conv3x3_relu(x, 2)          # conv_3 + relu
    x = conv3x3_relu(x, 3)          # conv_4 + relu
    x = bn(x, 2) + x_in             # bn3 + residual
    x = conv3x3_relu(x, 4)          # conv_5 + relu
    x = conv3x3_relu(x, 5)          # conv_6 + relu
    x = bn(x, 3) + x_in             # bn4 + residual
    x = bn(x, 4)                    # bn5

    o_ref[...] = x.astype(o_ref.dtype)


def _pack_conv_weights(conv_w, W, C):
    """conv_w: (6, 3, 3, Cin, Cout) HWIO -> (6, 3*W*C, W*C) block-banded matrices."""
    mats = []
    for i in range(conv_w.shape[0]):
        blocks = []
        for kh in range(3):                      # row-block order: dh = -1, 0, +1
            m = jnp.zeros((W * C, W * C), jnp.float32)
            for kw in range(3):
                dw = kw - 1
                # E[w', w] = 1 iff w' == w + dw  (W-border zero padding implied)
                shift_eye = jnp.eye(W, k=-dw, dtype=jnp.float32)
                m = m + jnp.kron(shift_eye, conv_w[i, kh, kw].astype(jnp.float32))
            blocks.append(m)
        mats.append(jnp.concatenate(blocks, axis=0))
    return jnp.stack(mats, axis=0)


def resblock_forward(x_nchw, conv_w, conv_b, gamma, beta):
    """x_nchw: (N, C, H, W). conv_w: (6,3,3,C,C) HWIO. conv_b: (6,C).
       gamma, beta: (5, C).  Returns (N, C, H, W)."""
    N, C, H, W = x_nchw.shape
    assert conv_w.shape[-1] == C  # mirrors the PyTorch assert on in_channels
    NH, WC = N * H, W * C

    # NCHW -> NHWC -> lane-dense 2-D view (N*H, W*C).
    x2d = jnp.transpose(x_nchw, (0, 2, 3, 1)).astype(jnp.float32).reshape(NH, WC)

    # Trace-time packing of parameters into the lane-dense layout.
    w_big = _pack_conv_weights(conv_w, W, C)                                # (6, 3*WC, WC)
    cb_t = jnp.tile(conv_b.astype(jnp.float32), (1, W)).reshape(6, 1, WC)   # bias tiled over W
    g_t = jnp.tile(gamma.astype(jnp.float32), (1, W)).reshape(5, 1, WC)
    b_t = jnp.tile(beta.astype(jnp.float32), (1, W)).reshape(5, 1, WC)
    # Channel pooling matrix: (v @ P)[w*C+c] = mean over (N,H,W) of channel c
    # when v is the row-sum of the lane-dense activations.
    p_mat = jnp.kron(jnp.ones((W, W), jnp.float32),
                     jnp.eye(C, dtype=jnp.float32)) / float(N * H * W)      # (WC, WC)
    # Border masks for the kh taps (zero the h==0 / h==H-1 rows so the sublane
    # rotation cannot leak across the image border or the batch boundary).
    h_of = jnp.arange(NH) % H
    m_top = jnp.broadcast_to((h_of >= 1).astype(jnp.float32)[:, None], (NH, WC))
    m_bot = jnp.broadcast_to((h_of <= H - 2).astype(jnp.float32)[:, None], (NH, WC))

    flops = int(6 * 2 * NH * (3 * WC) * WC        # conv matmuls
                + 5 * 2 * 2 * WC * WC)            # BN channel-pool matmuls (M=1)
    bytes_accessed = int(4 * (2 * NH * WC + w_big.size + cb_t.size + g_t.size
                              + b_t.size + p_mat.size + m_top.size + m_bot.size))
    cost = pl.CostEstimate(flops=flops, transcendentals=int(5 * WC),
                           bytes_accessed=bytes_accessed)

    kernel = pl.pallas_call(
        _resblock_kernel,
        out_shape=jax.ShapeDtypeStruct((NH, WC), jnp.float32),
        in_specs=[pl.BlockSpec(memory_space=pltpu.MemorySpace.VMEM)] * 8,
        out_specs=pl.BlockSpec(memory_space=pltpu.MemorySpace.VMEM),
        cost_estimate=cost,
        # No vmem_limit_bytes: total VMEM footprint here is < 2 MiB, well under
        # the default scoped limit on v5e/v6e/v7x.
    )
    y2d = kernel(x2d, w_big, cb_t, g_t, b_t, p_mat, m_top, m_bot)
    y = y2d.reshape(N, H, W, C)
    return jnp.transpose(y, (0, 3, 1, 2))  # back to NCHW


def resblock_ref(x_nchw, conv_w, conv_b, gamma, beta):
    """Pure-JAX reference (same math, XLA convs) for a correctness check."""
    x = jnp.transpose(x_nchw, (0, 2, 3, 1)).astype(jnp.float32)

    def bn(v, i):
        m = jnp.mean(v, axis=(0, 1, 2), keepdims=True)
        var = jnp.mean((v - m) ** 2, axis=(0, 1, 2), keepdims=True)
        return (v - m) / jnp.sqrt(var + EPS) * gamma[i] + beta[i]

    def conv(v, i):
        out = jax.lax.conv_general_dilated(
            v, conv_w[i], window_strides=(1, 1), padding=((1, 1), (1, 1)),
            dimension_numbers=("NHWC", "HWIO", "NHWC"))
        return out + conv_b[i]

    x_in = x
    v = bn(x_in, 0)
    v = jax.nn.relu(conv(v, 0))
    v = jax.nn.relu(conv(v, 1))
    v = bn(v, 1) + x_in
    v = jax.nn.relu(conv(v, 2))
    v = jax.nn.relu(conv(v, 3))
    v = bn(v, 2) + x_in
    v = jax.nn.relu(conv(v, 4))
    v = jax.nn.relu(conv(v, 5))
    v = bn(v, 3) + x_in
    v = bn(v, 4)
    return jnp.transpose(v, (0, 3, 1, 2))


if __name__ == "__main__":
    key = jax.random.PRNGKey(0)
    N, C, H, W = 2, 8, 16, 16
    ks = jax.random.split(key, 5)

    x = jax.random.normal(ks[0], (N, C, H, W), jnp.float32)
    # PyTorch Conv2d weight is (C_out, C_in, 3, 3); convert to HWIO for NHWC.
    w_oihw = 0.1 * jax.random.normal(ks[1], (6, C, C, 3, 3), jnp.float32)
    conv_w = jnp.transpose(w_oihw, (0, 3, 4, 2, 1))   # (6, 3, 3, C_in, C_out)
    conv_b = 0.1 * jax.random.normal(ks[2], (6, C), jnp.float32)
    gamma = 1.0 + 0.1 * jax.random.normal(ks[3], (5, C), jnp.float32)
    beta = 0.1 * jax.random.normal(ks[4], (5, C), jnp.float32)

    fwd = jax.jit(resblock_forward)
    y = jax.block_until_ready(fwd(x, conv_w, conv_b, gamma, beta))
    y_ref = resblock_ref(x, conv_w, conv_b, gamma, beta)

    assert y.shape == x.shape
    max_err = float(jnp.max(jnp.abs(y - y_ref)))
    assert jnp.allclose(y, y_ref, atol=1e-4, rtol=1e-4), max_err
    print("KERNEL_OK")
</pallas_src>

<mosaic_0001>
module attributes {stable_mosaic.version = 11 : i64} {
  func.func @_resblock_kernel(%arg0: memref<32x128xf32, #tpu.memory_space<vmem>>, %arg1: memref<6x384x128xf32, #tpu.memory_space<vmem>>, %arg2: memref<6x1x128xf32, #tpu.memory_space<vmem>>, %arg3: memref<5x1x128xf32, #tpu.memory_space<vmem>>, %arg4: memref<5x1x128xf32, #tpu.memory_space<vmem>>, %arg5: memref<128x128xf32, #tpu.memory_space<vmem>>, %arg6: memref<32x128xf32, #tpu.memory_space<vmem>>, %arg7: memref<32x128xf32, #tpu.memory_space<vmem>>, %arg8: memref<32x128xf32, #tpu.memory_space<vmem>>) attributes {dimension_semantics = [], scalar_prefetch = 0 : i64, scratch_operands = 0 : i64, tpu.core_type = #tpu.core_type<tc>} {
    %c0 = arith.constant 0 : index
    %c0_0 = arith.constant 0 : index
    %0 = vector.load %arg0[%c0, %c0_0] : memref<32x128xf32, #tpu.memory_space<vmem>>, vector<32x128xf32>
    %c0_1 = arith.constant 0 : index
    %c0_2 = arith.constant 0 : index
    %1 = vector.load %arg5[%c0_1, %c0_2] : memref<128x128xf32, #tpu.memory_space<vmem>>, vector<128x128xf32>
    %c0_3 = arith.constant 0 : index
    %c0_4 = arith.constant 0 : index
    %2 = vector.load %arg6[%c0_3, %c0_4] : memref<32x128xf32, #tpu.memory_space<vmem>>, vector<32x128xf32>
    %c0_5 = arith.constant 0 : index
    %c0_6 = arith.constant 0 : index
    %3 = vector.load %arg7[%c0_5, %c0_6] : memref<32x128xf32, #tpu.memory_space<vmem>>, vector<32x128xf32>
    %cst = arith.constant dense<0.000000e+00> : vector<128xf32>
    %4 = vector.multi_reduction <add>, %0, %cst [0] : vector<32x128xf32> to vector<128xf32>
    %5 = vector.shape_cast %4 : vector<128xf32> to vector<1x128xf32>
    %cst_7 = arith.constant dense<0.000000e+00> : vector<1x128xf32>
    %6 = tpu.matmul %5, %1, %cst_7 {dimension_numbers = #tpu.dot_dimension_numbers<[1], [0], [0], [1], [0, 0, 1, 1], [], []>} : vector<1x128xf32>, vector<128x128xf32>, vector<1x128xf32> -> vector<1x128xf32>
    %7 = vector.broadcast %6 : vector<1x128xf32> to vector<32x128xf32>
    %8 = arith.subf %0, %7 : vector<32x128xf32>
    %9 = arith.mulf %8, %8 : vector<32x128xf32>
    %cst_8 = arith.constant dense<0.000000e+00> : vector<128xf32>
    %10 = vector.multi_reduction <add>, %9, %cst_8 [0] : vector<32x128xf32> to vector<128xf32>
    %11 = vector.shape_cast %10 : vector<128xf32> to vector<1x128xf32>
    %cst_9 = arith.constant dense<0.000000e+00> : vector<1x128xf32>
    %12 = tpu.matmul %11, %1, %cst_9 {dimension_numbers = #tpu.dot_dimension_numbers<[1], [0], [0], [1], [0, 0, 1, 1], [], []>} : vector<1x128xf32>, vector<128x128xf32>, vector<1x128xf32> -> vector<1x128xf32>
    %cst_10 = arith.constant 9.99999974E-6 : f32
    %13 = vector.broadcast %cst_10 : f32 to vector<1x128xf32>
    %14 = arith.addf %12, %13 : vector<1x128xf32>
    %15 = math.rsqrt %14 : vector<1x128xf32>
    %c0_11 = arith.constant 0 : index
    %c0_12 = arith.constant 0 : index
    %c0_13 = arith.constant 0 : index
    %16 = vector.load %arg3[%c0_11, %c0_12, %c0_13] : memref<5x1x128xf32, #tpu.memory_space<vmem>>, vector<1x1x128xf32>
    %17 = vector.shape_cast %16 : vector<1x1x128xf32> to vector<1x128xf32>
    %18 = arith.mulf %15, %17 : vector<1x128xf32>
    %19 = vector.broadcast %18 : vector<1x128xf32> to vector<32x128xf32>
    %20 = arith.mulf %8, %19 : vector<32x128xf32>
    %c0_14 = arith.constant 0 : index
    %c0_15 = arith.constant 0 : index
    %c0_16 = arith.constant 0 : index
    %21 = vector.load %arg4[%c0_14, %c0_15, %c0_16] : memref<5x1x128xf32, #tpu.memory_space<vmem>>, vector<1x1x128xf32>
    %22 = vector.shape_cast %21 : vector<1x1x128xf32> to vector<1x128xf32>
    %23 = vector.broadcast %22 : vector<1x128xf32> to vector<32x128xf32>
    %24 = arith.addf %20, %23 : vector<32x128xf32>
    %c1_i32 = arith.constant 1 : i32
    %25 = tpu.dynamic_rotate %24 by %c1_i32 dim 0 : vector<32x128xf32>, i32 -> vector<32x128xf32>
    %26 = arith.mulf %25, %2 : vector<32x128xf32>
    %c31_i32 = arith.constant 31 : i32
    %27 = tpu.dynamic_rotate %24 by %c31_i32 dim 0 : vector<32x128xf32>, i32 -> vector<32x128xf32>
    %28 = arith.mulf %27, %3 : vector<32x128xf32>
    %29 = tpu.concatenate %26, %24, %28 in 1 : vector<32x128xf32>, vector<32x128xf32>, vector<32x128xf32> -> vector<32x384xf32>
    %c0_17 = arith.constant 0 : index
    %c0_18 = arith.constant 0 : index
    %c0_19 = arith.constant 0 : index
    %30 = vector.load %arg1[%c0_17, %c0_18, %c0_19] : memref<6x384x128xf32, #tpu.memory_space<vmem>>, vector<1x384x128xf32>
    %31 = vector.shape_cast %30 : vector<1x384x128xf32> to vector<384x128xf32>
    %cst_20 = arith.constant dense<0.000000e+00> : vector<32x128xf32>
    %32 = tpu.matmul %29, %31, %cst_20 {dimension_numbers = #tpu.dot_dimension_numbers<[1], [0], [0], [1], [0, 0, 1, 1], [], []>} : vector<32x384xf32>, vector<384x128xf32>, vector<32x128xf32> -> vector<32x128xf32>
    %c0_21 = arith.constant 0 : index
    %c0_22 = arith.constant 0 : index
    %c0_23 = arith.constant 0 : index
    %33 = vector.load %arg2[%c0_21, %c0_22, %c0_23] : memref<6x1x128xf32, #tpu.memory_space<vmem>>, vector<1x1x128xf32>
    %34 = vector.shape_cast %33 : vector<1x1x128xf32> to vector<1x128xf32>
    %35 = vector.broadcast %34 : vector<1x128xf32> to vector<32x128xf32>
    %36 = arith.addf %32, %35 : vector<32x128xf32>
    %cst_24 = arith.constant 0.000000e+00 : f32
    %37 = vector.broadcast %cst_24 : f32 to vector<32x128xf32>
    %38 = arith.maximumf %36, %37 : vector<32x128xf32>
    %c1_i32_25 = arith.constant 1 : i32
    %39 = tpu.dynamic_rotate %38 by %c1_i32_25 dim 0 : vector<32x128xf32>, i32 -> vector<32x128xf32>
    %40 = arith.mulf %39, %2 : vector<32x128xf32>
    %c31_i32_26 = arith.constant 31 : i32
    %41 = tpu.dynamic_rotate %38 by %c31_i32_26 dim 0 : vector<32x128xf32>, i32 -> vector<32x128xf32>
    %42 = arith.mulf %41, %3 : vector<32x128xf32>
    %43 = tpu.concatenate %40, %38, %42 in 1 : vector<32x128xf32>, vector<32x128xf32>, vector<32x128xf32> -> vector<32x384xf32>
    %c1 = arith.constant 1 : index
    %c0_27 = arith.constant 0 : index
    %c0_28 = arith.constant 0 : index
    %44 = vector.load %arg1[%c1, %c0_27, %c0_28] : memref<6x384x128xf32, #tpu.memory_space<vmem>>, vector<1x384x128xf32>
    %45 = vector.shape_cast %44 : vector<1x384x128xf32> to vector<384x128xf32>
    %cst_29 = arith.constant dense<0.000000e+00> : vector<32x128xf32>
    %46 = tpu.matmul %43, %45, %cst_29 {dimension_numbers = #tpu.dot_dimension_numbers<[1], [0], [0], [1], [0, 0, 1, 1], [], []>} : vector<32x384xf32>, vector<384x128xf32>, vector<32x128xf32> -> vector<32x128xf32>
    %c1_30 = arith.constant 1 : index
    %c0_31 = arith.constant 0 : index
    %c0_32 = arith.constant 0 : index
    %47 = vector.load %arg2[%c1_30, %c0_31, %c0_32] : memref<6x1x128xf32, #tpu.memory_space<vmem>>, vector<1x1x128xf32>
    %48 = vector.shape_cast %47 : vector<1x1x128xf32> to vector<1x128xf32>
    %49 = vector.broadcast %48 : vector<1x128xf32> to vector<32x128xf32>
    %50 = arith.addf %46, %49 : vector<32x128xf32>
    %cst_33 = arith.constant 0.000000e+00 : f32
    %51 = vector.broadcast %cst_33 : f32 to vector<32x128xf32>
    %52 = arith.maximumf %50, %51 : vector<32x128xf32>
    %cst_34 = arith.constant dense<0.000000e+00> : vector<128xf32>
    %53 = vector.multi_reduction <add>, %52, %cst_34 [0] : vector<32x128xf32> to vector<128xf32>
    %54 = vector.shape_cast %53 : vector<128xf32> to vector<1x128xf32>
    %cst_35 = arith.constant dense<0.000000e+00> : vector<1x128xf32>
    %55 = tpu.matmul %54, %1, %cst_35 {dimension_numbers = #tpu.dot_dimension_numbers<[1], [0], [0], [1], [0, 0, 1, 1], [], []>} : vector<1x128xf32>, vector<128x128xf32>, vector<1x128xf32> -> vector<1x128xf32>
    %56 = vector.broadcast %55 : vector<1x128xf32> to vector<32x128xf32>
    %57 = arith.subf %52, %56 : vector<32x128xf32>
    %58 = arith.mulf %57, %57 : vector<32x128xf32>
    %cst_36 = arith.constant dense<0.000000e+00> : vector<128xf32>
    %59 = vector.multi_reduction <add>, %58, %cst_36 [0] : vector<32x128xf32> to vector<128xf32>
    %60 = vector.shape_cast %59 : vector<128xf32> to vector<1x128xf32>
    %cst_37 = arith.constant dense<0.000000e+00> : vector<1x128xf32>
    %61 = tpu.matmul %60, %1, %cst_37 {dimension_numbers = #tpu.dot_dimension_numbers<[1], [0], [0], [1], [0, 0, 1, 1], [], []>} : vector<1x128xf32>, vector<128x128xf32>, vector<1x128xf32> -> vector<1x128xf32>
    %cst_38 = arith.constant 9.99999974E-6 : f32
    %62 = vector.broadcast %cst_38 : f32 to vector<1x128xf32>
    %63 = arith.addf %61, %62 : vector<1x128xf32>
    %64 = math.rsqrt %63 : vector<1x128xf32>
    %c1_39 = arith.constant 1 : index
    %c0_40 = arith.constant 0 : index
    %c0_41 = arith.constant 0 : index
    %65 = vector.load %arg3[%c1_39, %c0_40, %c0_41] : memref<5x1x128xf32, #tpu.memory_space<vmem>>, vector<1x1x128xf32>
    %66 = vector.shape_cast %65 : vector<1x1x128xf32> to vector<1x128xf32>
    %67 = arith.mulf %64, %66 : vector<1x128xf32>
    %68 = vector.broadcast %67 : vector<1x128xf32> to vector<32x128xf32>
    %69 = arith.mulf %57, %68 : vector<32x128xf32>
    %c1_42 = arith.constant 1 : index
    %c0_43 = arith.constant 0 : index
    %c0_44 = arith.constant 0 : index
    %70 = vector.load %arg4[%c1_42, %c0_43, %c0_44] : memref<5x1x128xf32, #tpu.memory_space<vmem>>, vector<1x1x128xf32>
    %71 = vector.shape_cast %70 : vector<1x1x128xf32> to vector<1x128xf32>
    %72 = vector.broadcast %71 : vector<1x128xf32> to vector<32x128xf32>
    %73 = arith.addf %69, %72 : vector<32x128xf32>
    %74 = arith.addf %73, %0 : vector<32x128xf32>
    %c1_i32_45 = arith.constant 1 : i32
    %75 = tpu.dynamic_rotate %74 by %c1_i32_45 dim 0 : vector<32x128xf32>, i32 -> vector<32x128xf32>
    %76 = arith.mulf %75, %2 : vector<32x128xf32>
    %c31_i32_46 = arith.constant 31 : i32
    %77 = tpu.dynamic_rotate %74 by %c31_i32_46 dim 0 : vector<32x128xf32>, i32 -> vector<32x128xf32>
    %78 = arith.mulf %77, %3 : vector<32x128xf32>
    %79 = tpu.concatenate %76, %74, %78 in 1 : vector<32x128xf32>, vector<32x128xf32>, vector<32x128xf32> -> vector<32x384xf32>
    %c2 = arith.constant 2 : index
    %c0_47 = arith.constant 0 : index
    %c0_48 = arith.constant 0 : index
    %80 = vector.load %arg1[%c2, %c0_47, %c0_48] : memref<6x384x128xf32, #tpu.memory_space<vmem>>, vector<1x384x128xf32>
    %81 = vector.shape_cast %80 : vector<1x384x128xf32> to vector<384x128xf32>
    %cst_49 = arith.constant dense<0.000000e+00> : vector<32x128xf32>
    %82 = tpu.matmul %79, %81, %cst_49 {dimension_numbers = #tpu.dot_dimension_numbers<[1], [0], [0], [1], [0, 0, 1, 1], [], []>} : vector<32x384xf32>, vector<384x128xf32>, vector<32x128xf32> -> vector<32x128xf32>
    %c2_50 = arith.constant 2 : index
    %c0_51 = arith.constant 0 : index
    %c0_52 = arith.constant 0 : index
    %83 = vector.load %arg2[%c2_50, %c0_51, %c0_52] : memref<6x1x128xf32, #tpu.memory_space<vmem>>, vector<1x1x128xf32>
    %84 = vector.shape_cast %83 : vector<1x1x128xf32> to vector<1x128xf32>
    %85 = vector.broadcast %84 : vector<1x128xf32> to vector<32x128xf32>
    %86 = arith.addf %82, %85 : vector<32x128xf32>
    %cst_53 = arith.constant 0.000000e+00 : f32
    %87 = vector.broadcast %cst_53 : f32 to vector<32x128xf32>
    %88 = arith.maximumf %86, %87 : vector<32x128xf32>
    %c1_i32_54 = arith.constant 1 : i32
    %89 = tpu.dynamic_rotate %88 by %c1_i32_54 dim 0 : vector<32x128xf32>, i32 -> vector<32x128xf32>
    %90 = arith.mulf %89, %2 : vector<32x128xf32>
    %c31_i32_55 = arith.constant 31 : i32
    %91 = tpu.dynamic_rotate %88 by %c31_i32_55 dim 0 : vector<32x128xf32>, i32 -> vector<32x128xf32>
    %92 = arith.mulf %91, %3 : vector<32x128xf32>
    %93 = tpu.concatenate %90, %88, %92 in 1 : vector<32x128xf32>, vector<32x128xf32>, vector<32x128xf32> -> vector<32x384xf32>
    %c3 = arith.constant 3 : index
    %c0_56 = arith.constant 0 : index
    %c0_57 = arith.constant 0 : index
    %94 = vector.load %arg1[%c3, %c0_56, %c0_57] : memref<6x384x128xf32, #tpu.memory_space<vmem>>, vector<1x384x128xf32>
    %95 = vector.shape_cast %94 : vector<1x384x128xf32> to vector<384x128xf32>
    %cst_58 = arith.constant dense<0.000000e+00> : vector<32x128xf32>
    %96 = tpu.matmul %93, %95, %cst_58 {dimension_numbers = #tpu.dot_dimension_numbers<[1], [0], [0], [1], [0, 0, 1, 1], [], []>} : vector<32x384xf32>, vector<384x128xf32>, vector<32x128xf32> -> vector<32x128xf32>
    %c3_59 = arith.constant 3 : index
    %c0_60 = arith.constant 0 : index
    %c0_61 = arith.constant 0 : index
    %97 = vector.load %arg2[%c3_59, %c0_60, %c0_61] : memref<6x1x128xf32, #tpu.memory_space<vmem>>, vector<1x1x128xf32>
    %98 = vector.shape_cast %97 : vector<1x1x128xf32> to vector<1x128xf32>
    %99 = vector.broadcast %98 : vector<1x128xf32> to vector<32x128xf32>
    %100 = arith.addf %96, %99 : vector<32x128xf32>
    %cst_62 = arith.constant 0.000000e+00 : f32
    %101 = vector.broadcast %cst_62 : f32 to vector<32x128xf32>
    %102 = arith.maximumf %100, %101 : vector<32x128xf32>
    %cst_63 = arith.constant dense<0.000000e+00> : vector<128xf32>
    %103 = vector.multi_reduction <add>, %102, %cst_63 [0] : vector<32x128xf32> to vector<128xf32>
    %104 = vector.shape_cast %103 : vector<128xf32> to vector<1x128xf32>
    %cst_64 = arith.constant dense<0.000000e+00> : vector<1x128xf32>
    %105 = tpu.matmul %104, %1, %cst_64 {dimension_numbers = #tpu.dot_dimension_numbers<[1], [0], [0], [1], [0, 0, 1, 1], [], []>} : vector<1x128xf32>, vector<128x128xf32>, vector<1x128xf32> -> vector<1x128xf32>
    %106 = vector.broadcast %105 : vector<1x128xf32> to vector<32x128xf32>
    %107 = arith.subf %102, %106 : vector<32x128xf32>
    %108 = arith.mulf %107, %107 : vector<32x128xf32>
    %cst_65 = arith.constant dense<0.000000e+00> : vector<128xf32>
    %109 = vector.multi_reduction <add>, %108, %cst_65 [0] : vector<32x128xf32> to vector<128xf32>
    %110 = vector.shape_cast %109 : vector<128xf32> to vector<1x128xf32>
    %cst_66 = arith.constant dense<0.000000e+00> : vector<1x128xf32>
    %111 = tpu.matmul %110, %1, %cst_66 {dimension_numbers = #tpu.dot_dimension_numbers<[1], [0], [0], [1], [0, 0, 1, 1], [], []>} : vector<1x128xf32>, vector<128x128xf32>, vector<1x128xf32> -> vector<1x128xf32>
    %cst_67 = arith.constant 9.99999974E-6 : f32
    %112 = vector.broadcast %cst_67 : f32 to vector<1x128xf32>
    %113 = arith.addf %111, %112 : vector<1x128xf32>
    %114 = math.rsqrt %113 : vector<1x128xf32>
    %c2_68 = arith.constant 2 : index
    %c0_69 = arith.constant 0 : index
    %c0_70 = arith.constant 0 : index
    %115 = vector.load %arg3[%c2_68, %c0_69, %c0_70] : memref<5x1x128xf32, #tpu.memory_space<vmem>>, vector<1x1x128xf32>
    %116 = vector.shape_cast %115 : vector<1x1x128xf32> to vector<1x128xf32>
    %117 = arith.mulf %114, %116 : vector<1x128xf32>
    %118 = vector.broadcast %117 : vector<1x128xf32> to vector<32x128xf32>
    %119 = arith.mulf %107, %118 : vector<32x128xf32>
    %c2_71 = arith.constant 2 : index
    %c0_72 = arith.constant 0 : index
    %c0_73 = arith.constant 0 : index
    %120 = vector.load %arg4[%c2_71, %c0_72, %c0_73] : memref<5x1x128xf32, #tpu.memory_space<vmem>>, vector<1x1x128xf32>
    %121 = vector.shape_cast %120 : vector<1x1x128xf32> to vector<1x128xf32>
    %122 = vector.broadcast %121 : vector<1x128xf32> to vector<32x128xf32>
    %123 = arith.addf %119, %122 : vector<32x128xf32>
    %124 = arith.addf %123, %0 : vector<32x128xf32>
    %c1_i32_74 = arith.constant 1 : i32
    %125 = tpu.dynamic_rotate %124 by %c1_i32_74 dim 0 : vector<32x128xf32>, i32 -> vector<32x128xf32>
    %126 = arith.mulf %125, %2 : vector<32x128xf32>
    %c31_i32_75 = arith.constant 31 : i32
    %127 = tpu.dynamic_rotate %124 by %c31_i32_75 dim 0 : vector<32x128xf32>, i32 -> vector<32x128xf32>
    %128 = arith.mulf %127, %3 : vector<32x128xf32>
    %129 = tpu.concatenate %126, %124, %128 in 1 : vector<32x128xf32>, vector<32x128xf32>, vector<32x128xf32> -> vector<32x384xf32>
    %c4 = arith.constant 4 : index
    %c0_76 = arith.constant 0 : index
    %c0_77 = arith.constant 0 : index
    %130 = vector.load %arg1[%c4, %c0_76, %c0_77] : memref<6x384x128xf32, #tpu.memory_space<vmem>>, vector<1x384x128xf32>
    %131 = vector.shape_cast %130 : vector<1x384x128xf32> to vector<384x128xf32>
    %cst_78 = arith.constant dense<0.000000e+00> : vector<32x128xf32>
    %132 = tpu.matmul %129, %131, %cst_78 {dimension_numbers = #tpu.dot_dimension_numbers<[1], [0], [0], [1], [0, 0, 1, 1], [], []>} : vector<32x384xf32>, vector<384x128xf32>, vector<32x128xf32> -> vector<32x128xf32>
    %c4_79 = arith.constant 4 : index
    %c0_80 = arith.constant 0 : index
    %c0_81 = arith.constant 0 : index
    %133 = vector.load %arg2[%c4_79, %c0_80, %c0_81] : memref<6x1x128xf32, #tpu.memory_space<vmem>>, vector<1x1x128xf32>
    %134 = vector.shape_cast %133 : vector<1x1x128xf32> to vector<1x128xf32>
    %135 = vector.broadcast %134 : vector<1x128xf32> to vector<32x128xf32>
    %136 = arith.addf %132, %135 : vector<32x128xf32>
    %cst_82 = arith.constant 0.000000e+00 : f32
    %137 = vector.broadcast %cst_82 : f32 to vector<32x128xf32>
    %138 = arith.maximumf %136, %137 : vector<32x128xf32>
    %c1_i32_83 = arith.constant 1 : i32
    %139 = tpu.dynamic_rotate %138 by %c1_i32_83 dim 0 : vector<32x128xf32>, i32 -> vector<32x128xf32>
    %140 = arith.mulf %139, %2 : vector<32x128xf32>
    %c31_i32_84 = arith.constant 31 : i32
    %141 = tpu.dynamic_rotate %138 by %c31_i32_84 dim 0 : vector<32x128xf32>, i32 -> vector<32x128xf32>
    %142 = arith.mulf %141, %3 : vector<32x128xf32>
    %143 = tpu.concatenate %140, %138, %142 in 1 : vector<32x128xf32>, vector<32x128xf32>, vector<32x128xf32> -> vector<32x384xf32>
    %c5 = arith.constant 5 : index
    %c0_85 = arith.constant 0 : index
    %c0_86 = arith.constant 0 : index
    %144 = vector.load %arg1[%c5, %c0_85, %c0_86] : memref<6x384x128xf32, #tpu.memory_space<vmem>>, vector<1x384x128xf32>
    %145 = vector.shape_cast %144 : vector<1x384x128xf32> to vector<384x128xf32>
    %cst_87 = arith.constant dense<0.000000e+00> : vector<32x128xf32>
    %146 = tpu.matmul %143, %145, %cst_87 {dimension_numbers = #tpu.dot_dimension_numbers<[1], [0], [0], [1], [0, 0, 1, 1], [], []>} : vector<32x384xf32>, vector<384x128xf32>, vector<32x128xf32> -> vector<32x128xf32>
    %c5_88 = arith.constant 5 : index
    %c0_89 = arith.constant 0 : index
    %c0_90 = arith.constant 0 : index
    %147 = vector.load %arg2[%c5_88, %c0_89, %c0_90] : memref<6x1x128xf32, #tpu.memory_space<vmem>>, vector<1x1x128xf32>
    %148 = vector.shape_cast %147 : vector<1x1x128xf32> to vector<1x128xf32>
    %149 = vector.broadcast %148 : vector<1x128xf32> to vector<32x128xf32>
    %150 = arith.addf %146, %149 : vector<32x128xf32>
    %cst_91 = arith.constant 0.000000e+00 : f32
    %151 = vector.broadcast %cst_91 : f32 to vector<32x128xf32>
    %152 = arith.maximumf %150, %151 : vector<32x128xf32>
    %cst_92 = arith.constant dense<0.000000e+00> : vector<128xf32>
    %153 = vector.multi_reduction <add>, %152, %cst_92 [0] : vector<32x128xf32> to vector<128xf32>
    %154 = vector.shape_cast %153 : vector<128xf32> to vector<1x128xf32>
    %cst_93 = arith.constant dense<0.000000e+00> : vector<1x128xf32>
    %155 = tpu.matmul %154, %1, %cst_93 {dimension_numbers = #tpu.dot_dimension_numbers<[1], [0], [0], [1], [0, 0, 1, 1], [], []>} : vector<1x128xf32>, vector<128x128xf32>, vector<1x128xf32> -> vector<1x128xf32>
    %156 = vector.broadcast %155 : vector<1x128xf32> to vector<32x128xf32>
    %157 = arith.subf %152, %156 : vector<32x128xf32>
    %158 = arith.mulf %157, %157 : vector<32x128xf32>
    %cst_94 = arith.constant dense<0.000000e+00> : vector<128xf32>
    %159 = vector.multi_reduction <add>, %158, %cst_94 [0] : vector<32x128xf32> to vector<128xf32>
    %160 = vector.shape_cast %159 : vector<128xf32> to vector<1x128xf32>
    %cst_95 = arith.constant dense<0.000000e+00> : vector<1x128xf32>
    %161 = tpu.matmul %160, %1, %cst_95 {dimension_numbers = #tpu.dot_dimension_numbers<[1], [0], [0], [1], [0, 0, 1, 1], [], []>} : vector<1x128xf32>, vector<128x128xf32>, vector<1x128xf32> -> vector<1x128xf32>
    %cst_96 = arith.constant 9.99999974E-6 : f32
    %162 = vector.broadcast %cst_96 : f32 to vector<1x128xf32>
    %163 = arith.addf %161, %162 : vector<1x128xf32>
    %164 = math.rsqrt %163 : vector<1x128xf32>
    %c3_97 = arith.constant 3 : index
    %c0_98 = arith.constant 0 : index
    %c0_99 = arith.constant 0 : index
    %165 = vector.load %arg3[%c3_97, %c0_98, %c0_99] : memref<5x1x128xf32, #tpu.memory_space<vmem>>, vector<1x1x128xf32>
    %166 = vector.shape_cast %165 : vector<1x1x128xf32> to vector<1x128xf32>
    %167 = arith.mulf %164, %166 : vector<1x128xf32>
    %168 = vector.broadcast %167 : vector<1x128xf32> to vector<32x128xf32>
    %169 = arith.mulf %157, %168 : vector<32x128xf32>
    %c3_100 = arith.constant 3 : index
    %c0_101 = arith.constant 0 : index
    %c0_102 = arith.constant 0 : index
    %170 = vector.load %arg4[%c3_100, %c0_101, %c0_102] : memref<5x1x128xf32, #tpu.memory_space<vmem>>, vector<1x1x128xf32>
    %171 = vector.shape_cast %170 : vector<1x1x128xf32> to vector<1x128xf32>
    %172 = vector.broadcast %171 : vector<1x128xf32> to vector<32x128xf32>
    %173 = arith.addf %169, %172 : vector<32x128xf32>
    %174 = arith.addf %173, %0 : vector<32x128xf32>
    %cst_103 = arith.constant dense<0.000000e+00> : vector<128xf32>
    %175 = vector.multi_reduction <add>, %174, %cst_103 [0] : vector<32x128xf32> to vector<128xf32>
    %176 = vector.shape_cast %175 : vector<128xf32> to vector<1x128xf32>
    %cst_104 = arith.constant dense<0.000000e+00> : vector<1x128xf32>
    %177 = tpu.matmul %176, %1, %cst_104 {dimension_numbers = #tpu.dot_dimension_numbers<[1], [0], [0], [1], [0, 0, 1, 1], [], []>} : vector<1x128xf32>, vector<128x128xf32>, vector<1x128xf32> -> vector<1x128xf32>
    %178 = vector.broadcast %177 : vector<1x128xf32> to vector<32x128xf32>
    %179 = arith.subf %174, %178 : vector<32x128xf32>
    %180 = arith.mulf %179, %179 : vector<32x128xf32>
    %cst_105 = arith.constant dense<0.000000e+00> : vector<128xf32>
    %181 = vector.multi_reduction <add>, %180, %cst_105 [0] : vector<32x128xf32> to vector<128xf32>
    %182 = vector.shape_cast %181 : vector<128xf32> to vector<1x128xf32>
    %cst_106 = arith.constant dense<0.000000e+00> : vector<1x128xf32>
    %183 = tpu.matmul %182, %1, %cst_106 {dimension_numbers = #tpu.dot_dimension_numbers<[1], [0], [0], [1], [0, 0, 1, 1], [], []>} : vector<1x128xf32>, vector<128x128xf32>, vector<1x128xf32> -> vector<1x128xf32>
    %cst_107 = arith.constant 9.99999974E-6 : f32
    %184 = vector.broadcast %cst_107 : f32 to vector<1x128xf32>
    %185 = arith.addf %183, %184 : vector<1x128xf32>
    %186 = math.rsqrt %185 : vector<1x128xf32>
    %c4_108 = arith.constant 4 : index
    %c0_109 = arith.constant 0 : index
    %c0_110 = arith.constant 0 : index
    %187 = vector.load %arg3[%c4_108, %c0_109, %c0_110] : memref<5x1x128xf32, #tpu.memory_space<vmem>>, vector<1x1x128xf32>
    %188 = vector.shape_cast %187 : vector<1x1x128xf32> to vector<1x128xf32>
    %189 = arith.mulf %186, %188 : vector<1x128xf32>
    %190 = vector.broadcast %189 : vector<1x128xf32> to vector<32x128xf32>
    %191 = arith.mulf %179, %190 : vector<32x128xf32>
    %c4_111 = arith.constant 4 : index
    %c0_112 = arith.constant 0 : index
    %c0_113 = arith.constant 0 : index
    %192 = vector.load %arg4[%c4_111, %c0_112, %c0_113] : memref<5x1x128xf32, #tpu.memory_space<vmem>>, vector<1x1x128xf32>
    %193 = vector.shape_cast %192 : vector<1x1x128xf32> to vector<1x128xf32>
    %194 = vector.broadcast %193 : vector<1x128xf32> to vector<32x128xf32>
    %195 = arith.addf %191, %194 : vector<32x128xf32>
    %c0_114 = arith.constant 0 : index
    %c0_115 = arith.constant 0 : index
    %196 = vector.load %arg8[%c0_114, %c0_115] : memref<32x128xf32, #tpu.memory_space<vmem>>, vector<32x128xf32>
    tpu.vector_store %arg8[%c0_114, %c0_115], %195 {strides = array<i32>} : memref<32x128xf32, #tpu.memory_space<vmem>>, vector<32x128xf32>,
    return
  }
}

</mosaic_0001>

<bundles_post_ra>
// kernel: resblock_forward.1
= control target key start
LH: loop header
LB: loop body
LE: loop exit
PB: predicated region body
PF: predicated region fallthrough
CT: control target
= control target key end

     0   :  { %s3633_s5 = inlined_call_operand.vmem [shape: f32[128,128], index: 5, kind: input, shape index: {}]   ;;  %s3634_s0 = inlined_call_operand.vmem [shape: f32[32,128], index: 0, kind: input, shape index: {}]   ;;  %s3635_s1 = inlined_call_operand.vmem [shape: f32[6,384,128], index: 1, kind: input, shape index: {}]   ;;  %s3636_s4 = inlined_call_operand.vmem [shape: f32[5,1,128], index: 4, kind: input, shape index: {}]   ;;  %s3637_s3 = inlined_call_operand.vmem [shape: f32[5,1,128], index: 3, kind: input, shape index: {}]   ;;  %s3638_s6 = inlined_call_operand.vmem [shape: f32[32,128], index: 6, kind: input, shape index: {}]   ;;  %s3639_s7 = inlined_call_operand.vmem [shape: f32[32,128], index: 7, kind: input, shape index: {}]   ;;  %s3640_s2 = inlined_call_operand.vmem [shape: f32[6,1,128], index: 2, kind: input, shape index: {}]   ;;  %s3641_s8 = inlined_call_operand.vmem [shape: f32[32,128], index: 8, kind: output, shape index: {}]  }
   0x1   :  { %v1931_v0 = vld [vmem:[%s3633_s5 + $0x78] sm:$0xff]  ;;  %v1936_v1 = vld [vmem:[%s3633_s5 + $0x70] sm:$0xff]  ;;  %v1943_v2 = vld [vmem:[%s3633_s5 + $0x68] sm:$0xff] }
   0x2   :  { %66 = vmatpush.msra.mxu0 %v1931_v0  ;;  %104 = vmatpush.msra.mxu1 %v1931_v0  ;;  %v1950_v3 = vld [vmem:[%s3633_s5 + $0x60] sm:$0xff]  ;;  %v30_v5 = vld [vmem:[%s3634_s0 + $0x8] sm:$0xff]  ;;  %v1963_v6 = vld [vmem:[%s3633_s5 + $0x58] sm:$0xff] }
   0x3   :  { %v29_v4 = vld [vmem:[%s3634_s0] sm:$0xff]  ;;  %v31_v7 = vld [vmem:[%s3634_s0 + $0x10] sm:$0xff]  ;;  %v32_v9 = vld [vmem:[%s3634_s0 + $0x18] sm:$0xff] }
   0x4   :  { %67 = vmatpush.msra.mxu0 %v1936_v1  ;;  %105 = vmatpush.msra.mxu1 %v1936_v1  ;;  %v57_v8 = vadd.f32 %v30_v5, %v29_v4  ;;  %v1976_v10 = vld [vmem:[%s3633_s5 + $0x50] sm:$0xff]  ;;  %v1983_v12 = vld [vmem:[%s3633_s5 + $0x48] sm:$0xff]  ;;  %v1990_v14 = vld [vmem:[%s3633_s5 + $0x40] sm:$0xff] }
   0x5   :  { %v1997_v16 = vld [vmem:[%s3633_s5 + $0x38] sm:$0xff]  ;;  %v2004_v18 = vld [vmem:[%s3633_s5 + $0x30] sm:$0xff]  ;;  %v2011_v20 = vld [vmem:[%s3633_s5 + $0x28] sm:$0xff] }
   0x6   :  { %68 = vmatpush.msra.mxu0 %v1943_v2  ;;  %106 = vmatpush.msra.mxu1 %v1943_v2  ;;  %v58_v11 = vadd.f32 %v57_v8, %v31_v7  ;;  %v2018_v21 = vld [vmem:[%s3633_s5 + $0x20] sm:$0xff]  ;;  %v2025_v23 = vld [vmem:[%s3633_s5 + $0x18] sm:$0xff]  ;;  %v2032_v24 = vld [vmem:[%s3633_s5 + $0x10] sm:$0xff] }
   0x7   :  { %v2039_v26 = vld [vmem:[%s3633_s5 + $0x8] sm:$0xff]  ;;  %v2046_v27 = vld [vmem:[%s3633_s5] sm:$0xff]  ;;  %v208_v29 = vld [vmem:[%s3635_s1 + $0xf8] sm:$0xff] }
   0x8   :  { %69 = vmatpush.msra.mxu0 %v1950_v3  ;;  %107 = vmatpush.msra.mxu1 %v1950_v3  ;;  %v59_v13 = vadd.f32 %v58_v11, %v32_v9  ;;  %v207_v49 = vld [vmem:[%s3635_s1 + $0xf0] sm:$0xff]  ;;  %v206_v50 = vld [vmem:[%s3635_s1 + $0xe8] sm:$0xff]  ;;  %v192_v51 = vld [vmem:[%s3635_s1 + $0x78] sm:$0xff] }
   0x9   :  { %258 = vmatpush.msra.mxu3 %v208_v29  ;;  %v224_v52 = vld [vmem:[%s3635_s1 + $0x178] sm:$0xff]  ;;  %229 = vmatpush.msra.mxu2 %v192_v51  ;;  %v205_v53 = vld [vmem:[%s3635_s1 + $0xe0] sm:$0xff]  ;;  %v191_v54 = vld [vmem:[%s3635_s1 + $0x70] sm:$0xff] }
   0xa   :  { %70 = vmatpush.msra.mxu0 %v1963_v6  ;;  %108 = vmatpush.msra.mxu1 %v1963_v6  ;;  %v60_v15 = vrot.slane %v59_v13, 4  ;;  %v223_v55 = vld [vmem:[%s3635_s1 + $0x170] sm:$0xff]  ;;  %v204_v56 = vld [vmem:[%s3635_s1 + $0xd8] sm:$0xff]  ;;  %v190_v57 = vld [vmem:[%s3635_s1 + $0x68] sm:$0xff] }
   0xb   :  { %259 = vmatpush.msra.mxu3 %v207_v49  ;;  %230 = vmatpush.msra.mxu2 %v191_v54  ;;  %v222_v58 = vld [vmem:[%s3635_s1 + $0x168] sm:$0xff]  ;;  %v203_v59 = vld [vmem:[%s3635_s1 + $0xd0] sm:$0xff]  ;;  %v189_v60 = vld [vmem:[%s3635_s1 + $0x60] sm:$0xff] }
   0xc   :  { %71 = vmatpush.msra.mxu0 %v1976_v10  ;;  %109 = vmatpush.msra.mxu1 %v1976_v10  ;;  %v61_v17 = vadd.f32 %v60_v15, %v59_v13  ;;  %v221_v61 = vld [vmem:[%s3635_s1 + $0x160] sm:$0xff]  ;;  %v202_v62 = vld [vmem:[%s3635_s1 + $0xc8] sm:$0xff]  ;;  %v188_v63 = vld [vmem:[%s3635_s1 + $0x58] sm:$0xff] }
   0xd   :  { %260 = vmatpush.msra.mxu3 %v206_v50  ;;  %231 = vmatpush.msra.mxu2 %v190_v57  ;;  %v219_v8 = vld [vmem:[%s3635_s1 + $0x150] sm:$0xff]  ;;  %v186_v11 = vld [vmem:[%s3635_s1 + $0x48] sm:$0xff]  ;;  %v197_v29 = vld [vmem:[%s3635_s1 + $0xa0] sm:$0xff] }
   0xe   :  { %72 = vmatpush.msra.mxu0 %v1983_v12  ;;  %110 = vmatpush.msra.mxu1 %v1983_v12  ;;  %v62_v19 = vrot.slane %v61_v17, 2  ;;  %v218_v13 = vld [vmem:[%s3635_s1 + $0x148] sm:$0xff]  ;;  %v199_v15 = vld [vmem:[%s3635_s1 + $0xb0] sm:$0xff]  ;;  %v177_v50 = vld [vmem:[%s3635_s1] sm:$0xff] }
   0xf   :  { %261 = vmatpush.msra.mxu3 %v205_v53  ;;  %232 = vmatpush.msra.mxu2 %v189_v60  ;;  %v210_v49 = vld [vmem:[%s3635_s1 + $0x108] sm:$0xff]  ;;  %v209_v51 = vld [vmem:[%s3635_s1 + $0x100] sm:$0xff] }
  0x10   :  { %73 = vmatpush.msra.mxu0 %v1990_v14  ;;  %111 = vmatpush.msra.mxu1 %v1990_v14  ;;  %v63_v22 = vadd.f32 %v62_v19, %v61_v17  ;;  %v185_v17 = vld [vmem:[%s3635_s1 + $0x40] sm:$0xff] }
  0x11   :  { %262 = vmatpush.msra.mxu3 %v204_v56  ;;  %233 = vmatpush.msra.mxu2 %v188_v63  ;;  %v217_v19 = vld [vmem:[%s3635_s1 + $0x140] sm:$0xff] }
  0x12   :  { %74 = vmatpush.msra.mxu0 %v1997_v16  ;;  %112 = vmatpush.msra.mxu1 %v1997_v16  ;;  %v64_v25 = vrot.slane %v63_v22, 1  ;;  %v134_v60 = vld [vmem:[%s3637_s3] sm:$0x1] }
  0x13   :  { %263 = vmatpush.msra.mxu3 %v203_v59 }
  0x14   :  { %75 = vmatpush.msra.mxu0 %v2004_v18  ;;  %113 = vmatpush.msra.mxu1 %v2004_v18  ;;  %v65_v28 = vadd.f32 %v64_v25, %v63_v22  ;;  %v198_v22 = vld [vmem:[%s3635_s1 + $0xa8] sm:$0xff]  ;;  %v184_v25 = vld [vmem:[%s3635_s1 + $0x38] sm:$0xff] }
  0x15   :  { %264 = vmatpush.msra.mxu3 %v202_v62  ;;  %v153_v62 = vlaneseq }
  0x16   :  { %76 = vmatpush.msra.mxu0 %v2011_v20  ;;  %114 = vmatpush.msra.mxu1 %v2011_v20 }
  0x18   :  { %77 = vmatpush.msra.mxu0 %v2018_v21  ;;  %115 = vmatpush.msra.mxu1 %v2018_v21 }
  0x1a   :  { %78 = vmatpush.msra.mxu0 %v2025_v23  ;;  %116 = vmatpush.msra.mxu1 %v2025_v23 }
  0x1c   :  { %79 = vmatpush.msra.mxu0 %v2032_v24  ;;  %117 = vmatpush.msra.mxu1 %v2032_v24 }
  0x1e   :  { %80 = vmatpush.msra.mxu0 %v2039_v26  ;;  %118 = vmatpush.msra.mxu1 %v2039_v26 }
  0x20   :  { %81 = vmatpush.msra.mxu0 %v2046_v27  ;;  %119 = vmatpush.msra.mxu1 %v2046_v27 }
  0x21   :  { %82 = vmatmul.f32.vlgmr.msra.gmra.mxu0 %v65_v28  ;;  %v216_v28 = vld [vmem:[%s3635_s1 + $0x138] sm:$0xff] }
  0x22   :  { %287 = vmatpush.msrb.mxu0 %v224_v52 }
  0x24   :  { %288 = vmatpush.msrb.mxu0 %v223_v55 }
  0x26   :  { %289 = vmatpush.msrb.mxu0 %v222_v58 }
  0x28   :  { %290 = vmatpush.msrb.mxu0 %v221_v61 }
  0x9e   :  { %v83_v30 = vpop.f32.mrf.mxu0 }
  0x9f   :  { %v86_v31 = vperm.slane %v83_v30, 0  ;;  %v183_v30 = vld [vmem:[%s3635_s1 + $0x30] sm:$0xff] }
  0xa1   :  { %v2055_v32 = vsub.f32 %v29_v4, %v86_v31  ;;  %v2057_v33 = vsub.f32 %v30_v5, %v86_v31  ;;  %v2059_v34 = vsub.f32 %v31_v7, %v86_v31  ;;  %v2061_v35 = vsub.f32 %v32_v9, %v86_v31  ;;  %v220_v4 = vld [vmem:[%s3635_s1 + $0x158] sm:$0xff]  ;;  %v201_v5 = vld [vmem:[%s3635_s1 + $0xc0] sm:$0xff]  ;;  %v187_v7 = vld [vmem:[%s3635_s1 + $0x50] sm:$0xff] }
  0xa2   :  { %291 = vmatpush.msrb.mxu0 %v220_v4  ;;  %265 = vmatpush.msra.mxu3 %v201_v5  ;;  %v200_v9 = vld [vmem:[%s3635_s1 + $0xb8] sm:$0xff]  ;;  %v215_v31 = vld [vmem:[%s3635_s1 + $0x130] sm:$0xff]  ;;  %v1814_v5 = vld [vmem:[%s3636_s4] ss:$0 sm:$0xff] }
  0xa3   :  { %v91_v36 = vmul.f32 %v2055_v32, %v2055_v32  ;;  %v92_v37 = vmul.f32 %v2057_v33, %v2057_v33  ;;  %v93_v38 = vmul.f32 %v2059_v34, %v2059_v34  ;;  %v94_v40 = vmul.f32 %v2061_v35, %v2061_v35  ;;  %234 = vmatpush.msra.mxu2 %v187_v7 }
  0xa4   :  { %292 = vmatpush.msrb.mxu0 %v219_v8  ;;  %266 = vmatpush.msra.mxu3 %v200_v9  ;;  %v2229_v7 = vshrl.u32 %v153_v62, 7 }
  0xa5   :  { %v95_v39 = vadd.f32 %v92_v37, %v91_v36  ;;  %235 = vmatpush.msra.mxu2 %v186_v11  ;;  %v196_v36 = vld [vmem:[%s3635_s1 + $0x98] sm:$0xff]  ;;  %v182_v37 = vld [vmem:[%s3635_s1 + $0x28] sm:$0xff] }
  0xa6   :  { %293 = vmatpush.msrb.mxu0 %v218_v13  ;;  %267 = vmatpush.msra.mxu3 %v199_v15  ;;  %v1592_v15 = vld [vmem:[%s3635_s1 + $0x278] sm:$0xff]  ;;  %vm155_vm3 = vcmp.lt.s32.totalorder %v2229_v7, 1  ;;  %vm168_vm4 = vcmp.lt.s32.totalorder %v2229_v7, 7 }
  0xa7   :  { %v96_v41 = vadd.f32 %v95_v39, %v93_v38  ;;  %236 = vmatpush.msra.mxu2 %v185_v17  ;;  %v214_v38 = vld [vmem:[%s3635_s1 + $0x128] sm:$0xff]  ;;  %v195_v39 = vld [vmem:[%s3635_s1 + $0x90] sm:$0xff] }
  0xa8   :  { %294 = vmatpush.msrb.mxu0 %v217_v19  ;;  %268 = vmatpush.msra.mxu3 %v198_v22  ;;  %v1591_v17 = vld [vmem:[%s3635_s1 + $0x270] sm:$0xff] }
  0xa9   :  { %v97_v42 = vadd.f32 %v96_v41, %v94_v40  ;;  %237 = vmatpush.msra.mxu2 %v184_v25  ;;  %v181_v40 = vld [vmem:[%s3635_s1 + $0x20] sm:$0xff]  ;;  %v1608_v25 = vld [vmem:[%s3635_s1 + $0x2f8] sm:$0xff] }
  0xaa   :  { %295 = vmatpush.msrb.mxu0 %v216_v28  ;;  %269 = vmatpush.msra.mxu3 %v197_v29  ;;  %v213_v41 = vld [vmem:[%s3635_s1 + $0x120] sm:$0xff] }
  0xab   :  { %v98_v43 = vrot.slane %v97_v42, 4  ;;  %238 = vmatpush.msra.mxu2 %v183_v30 }
  0xac   :  { %296 = vmatpush.msrb.mxu0 %v215_v31  ;;  %270 = vmatpush.msra.mxu3 %v196_v36  ;;  %v2268_v31 = vld [vmem:[%s3639_s7] sm:$0xff] }
  0xad   :  { %v99_v44 = vadd.f32 %v98_v43, %v97_v42  ;;  %239 = vmatpush.msra.mxu2 %v182_v37  ;;  %v194_v42 = vld [vmem:[%s3635_s1 + $0x88] sm:$0xff]  ;;  %v180_v43 = vld [vmem:[%s3635_s1 + $0x18] sm:$0xff]  ;;  %v1607_v37 = vld [vmem:[%s3635_s1 + $0x2f0] sm:$0xff] }
  0xae   :  { %297 = vmatpush.msrb.mxu0 %v214_v38  ;;  %271 = vmatpush.msra.mxu3 %v195_v39  ;;  %v1589_v38 = vld [vmem:[%s3635_s1 + $0x260] sm:$0xff] }
  0xaf   :  { %v100_v45 = vrot.slane %v99_v44, 2  ;;  %240 = vmatpush.msra.mxu2 %v181_v40 }
  0xb0   :  { %298 = vmatpush.msrb.mxu0 %v213_v41  ;;  %272 = vmatpush.msra.mxu3 %v194_v42 }
  0xb1   :  { %v101_v46 = vadd.f32 %v100_v45, %v99_v44  ;;  %v212_v44 = vld [vmem:[%s3635_s1 + $0x118] sm:$0xff]  ;;  %v193_v45 = vld [vmem:[%s3635_s1 + $0x80] sm:$0xff]  ;;  %241 = vmatpush.msra.mxu2 %v180_v43 }
  0xb2   :  { %299 = vmatpush.msrb.mxu0 %v212_v44  ;;  %273 = vmatpush.msra.mxu3 %v193_v45  ;;  %v1588_v45 = vld [vmem:[%s3635_s1 + $0x258] sm:$0xff] }
  0xb3   :  { %v102_v47 = vrot.slane %v101_v46, 1 }
  0xb4   :  { %456 = vmatpush.msrb.mxu3 %v1608_v25  ;;  %v1580_v25 = vld [vmem:[%s3635_s1 + $0x218] sm:$0xff] }
  0xb5   :  { %v103_v48 = vadd.f32 %v102_v47, %v101_v46  ;;  %v179_v46 = vld [vmem:[%s3635_s1 + $0x10] sm:$0xff] }
  0xb6   :  { %v211_v47 = vld [vmem:[%s3635_s1 + $0x110] sm:$0xff]  ;;  %242 = vmatpush.msra.mxu2 %v179_v46  ;;  %457 = vmatpush.msrb.mxu3 %v1607_v37  ;;  %v1578_v37 = vld [vmem:[%s3635_s1 + $0x208] sm:$0xff] }
  0xb7   :  { %120 = vmatmul.f32.vlgmr.msra.gmra.mxu1 %v103_v48  ;;  %300 = vmatpush.msrb.mxu0 %v211_v47  ;;  %v178_v48 = vld [vmem:[%s3635_s1 + $0x8] sm:$0xff]  ;;  %v1587_v46 = vld [vmem:[%s3635_s1 + $0x250] sm:$0xff] }
  0xb8   :  { %243 = vmatpush.msra.mxu2 %v178_v48  ;;  %v1586_v47 = vld [vmem:[%s3635_s1 + $0x248] sm:$0xff] }
  0xb9   :  { %301 = vmatpush.msrb.mxu0 %v210_v49  ;;  %v2296_v48 = vld [vmem:[%s3638_s6 + $0x8] sm:$0xff] }
  0xba   :  { %244 = vmatpush.msra.mxu2 %v177_v50  ;;  %v2303_v50 = vld [vmem:[%s3639_s7 + $0x8] sm:$0xff] }
  0xbb   :  { %302 = vmatpush.msrb.mxu0 %v209_v51 }
  0xbc   :  { %427 = vmatpush.msrb.mxu2 %v1592_v15  ;;  %v1606_v15 = vld [vmem:[%s3635_s1 + $0x2e8] sm:$0xff] }
  0xbd   :  { %498 = vmatpush.msra.mxu0 %v1931_v0  ;;  %458 = vmatpush.msrb.mxu3 %v1606_v15  ;;  %v1563_v15 = vld [vmem:[%s3635_s1 + $0x190] sm:$0xff] }
  0xbe   :  { %428 = vmatpush.msrb.mxu2 %v1591_v17  ;;  %v1583_v17 = vld [vmem:[%s3635_s1 + $0x230] sm:$0xff] }
  0xbf   :  { %499 = vmatpush.msra.mxu0 %v1936_v1 }
  0xc1   :  { %500 = vmatpush.msra.mxu0 %v1943_v2 }
  0xc3   :  { %501 = vmatpush.msra.mxu0 %v1950_v3 }
  0xc5   :  { %502 = vmatpush.msra.mxu0 %v1963_v6 }
  0xc7   :  { %503 = vmatpush.msra.mxu0 %v1976_v10 }
  0xc9   :  { %504 = vmatpush.msra.mxu0 %v1983_v12 }
  0xcb   :  { %505 = vmatpush.msra.mxu0 %v1990_v14 }
  0xcd   :  { %506 = vmatpush.msra.mxu0 %v1997_v16 }
  0xcf   :  { %507 = vmatpush.msra.mxu0 %v2004_v18 }
  0xd1   :  { %508 = vmatpush.msra.mxu0 %v2011_v20 }
  0xd3   :  { %509 = vmatpush.msra.mxu0 %v2018_v21 }
  0xd5   :  { %510 = vmatpush.msra.mxu0 %v2025_v23 }
  0xd7   :  { %511 = vmatpush.msra.mxu0 %v2032_v24 }
  0xd9   :  { %512 = vmatpush.msra.mxu0 %v2039_v26 }
  0xdb   :  { %513 = vmatpush.msra.mxu0 %v2046_v27 }
 0x134   :  { %v121_v52 = vpop.f32.mrf.mxu1 }
 0x135   :  { %v122_v53 = vadd.f32 1e-05, %v121_v52  ;;  %v1585_v52 = vld [vmem:[%s3635_s1 + $0x240] sm:$0xff] }
 0x137   :  { %1825 = vrsqrt.f32 %v122_v53  ;;  %vm130_vm1 = vweird.f32 %v122_v53 }
 0x13d   :  { %v1826_v54 = vpop.eup %1825 }
 0x13e   :  { %v125_v55 = vmul.f32 %v1826_v54, %v122_v53  ;;  %vm131_vm0 = vweird.f32 %v1826_v54 }
 0x13f   :  { %vm132_vm2 = vmor %vm130_vm1, %vm131_vm0 }
 0x140   :  { %v126_v56 = vmul.f32 %v1826_v54, %v125_v55 }
 0x142   :  { %v127_v57 = vmul.f32 0.5, %v126_v56 }
 0x144   :  { %v128_v58 = vsub.f32 1.5, %v127_v57  ;;  %v2316_v57 = vld [vmem:[%s3638_s6 + $0x10] sm:$0xff] }
 0x146   :  { %v129_v59 = vmul.f32 %v1826_v54, %v128_v58 }
 0x148   :  { %v133_v61 = vsel %vm132_vm2, %v1826_v54, %v129_v59  ;;  %v2323_v59 = vld [vmem:[%s3639_s7 + $0x10] sm:$0xff] }
 0x149   :  { %v135_v63 = vmul.f32 %v134_v60, %v133_v61 }
 0x14b   :  { %v136_v4 = vperm.slane %v135_v63, 0  ;;  %v2333_v63 = vld [vmem:[%s3638_s6 + $0x18] sm:$0xff] }
 0x14d   :  { %v137_v8 = vmul.f32 %v136_v4, %v2055_v32  ;;  %v140_v9 = vmul.f32 %v136_v4, %v2061_v35  ;;  %v138_v11 = vmul.f32 %v136_v4, %v2057_v33  ;;  %v139_v13 = vmul.f32 %v136_v4, %v2059_v34  ;;  %v2250_v33 = vld [vmem:[%s3638_s6] sm:$0xff]  ;;  %v1590_v35 = vld [vmem:[%s3635_s1 + $0x268] sm:$0xff] }
 0x14e   :  { %429 = vmatpush.msrb.mxu2 %v1590_v35  ;;  %v1603_v35 = vld [vmem:[%s3635_s1 + $0x2d0] sm:$0xff] }
 0x14f   :  { %v2243_v19 = vadd.f32 %v1814_v5, %v137_v8  ;;  %v2245_v22 = vadd.f32 %v1814_v5, %v140_v9  ;;  %v146_v32 = vadd.f32 %v1814_v5, %v138_v11  ;;  %v147_v34 = vadd.f32 %v1814_v5, %v139_v13  ;;  %v2340_v5 = vld [vmem:[%s3639_s7 + $0x18] sm:$0xff] }
 0x150   :  { %430 = vmatpush.msrb.mxu2 %v1589_v38  ;;  %v1584_v13 = vld [vmem:[%s3635_s1 + $0x238] sm:$0xff] }
 0x151   :  { %v164_v28 = vrot.slane %v2243_v19, 1  ;;  %274 = vmatmul.f32.vlgmr.msra.gmra.mxu3 %v2243_v19  ;;  %v149_v29 = vrot.slane %v2243_v19, 7  ;;  %v152_v30 = vrot.slane %v2245_v22, 7  ;;  %v165_v36 = vrot.slane %v146_v32, 1  ;;  %v1605_v19 = vld [vmem:[%s3635_s1 + $0x2e0] sm:$0xff]  ;;  %v1600_v38 = vld [vmem:[%s3635_s1 + $0x2b8] sm:$0xff] }
 0x152   :  { %v150_v43 = vrot.slane %v146_v32, 7  ;;  %v166_v44 = vrot.slane %v147_v34, 1  ;;  %431 = vmatpush.msrb.mxu2 %v1588_v45  ;;  %v151_v55 = vrot.slane %v147_v34, 7  ;;  %v167_v56 = vrot.slane %v2245_v22, 1  ;;  %459 = vmatpush.msrb.mxu3 %v1605_v19  ;;  %v1597_v45 = vld [vmem:[%s3635_s1 + $0x2a0] sm:$0xff]  ;;  %v1562_v19 = vld [vmem:[%s3635_s1 + $0x188] sm:$0xff] }
 0x153   :  { %v159_v39 = vsel %vm155_vm3, %v152_v30, %v149_v29  ;;  %v171_v40 = vsel %vm168_vm4, %v164_v28, %v165_v36 }
 0x154   :  { %v160_v41 = vmul.f32 %v159_v39, %v2250_v33  ;;  %v173_v42 = vmul.f32 %v171_v40, %v2268_v31  ;;  %v158_v49 = vsel %vm155_vm3, %v149_v29, %v150_v43  ;;  %v170_v51 = vsel %vm168_vm4, %v165_v36, %v166_v44  ;;  %432 = vmatpush.msrb.mxu2 %v1587_v46  ;;  %v1579_v29 = vld [vmem:[%s3635_s1 + $0x210] sm:$0xff]  ;;  %v1576_v36 = vld [vmem:[%s3635_s1 + $0x1f8] sm:$0xff]  ;;  %v1577_v39 = vld [vmem:[%s3635_s1 + $0x200] sm:$0xff] }
 0x155   :  { %v161_v53 = vmul.f32 %v158_v49, %v2296_v48  ;;  %v174_v54 = vmul.f32 %v170_v51, %v2303_v50  ;;  %v157_v58 = vsel %vm155_vm3, %v150_v43, %v151_v55  ;;  %v169_v60 = vsel %vm168_vm4, %v166_v44, %v167_v56  ;;  %398 = vmatpush.msrb.mxu1 %v1576_v36  ;;  %v1575_v40 = vld [vmem:[%s3635_s1 + $0x1f0] sm:$0xff]  ;;  %v1598_v43 = vld [vmem:[%s3635_s1 + $0x2a8] sm:$0xff]  ;;  %v1573_v44 = vld [vmem:[%s3635_s1 + $0x1e0] sm:$0xff] }
 0x156   :  { %245 = vmatmul.f32.vlgmr.msra.gmra.mxu2 %v160_v41  ;;  %303 = vmatmul.f32.vlgmr.msrb.gmra.mxu0 %v173_v42  ;;  %v162_v61 = vmul.f32 %v157_v58, %v2316_v57  ;;  %v175_v62 = vmul.f32 %v169_v60, %v2323_v59  ;;  %v156_v4 = vsel %vm155_vm3, %v151_v55, %v152_v30  ;;  %v1601_v30 = vld [vmem:[%s3635_s1 + $0x2c0] sm:$0xff]  ;;  %v1599_v41 = vld [vmem:[%s3635_s1 + $0x2b0] sm:$0xff]  ;;  %v1574_v42 = vld [vmem:[%s3635_s1 + $0x1e8] sm:$0xff] }
 0x157   :  { %433 = vmatpush.msrb.mxu2 %v1586_v47  ;;  %v172_v8 = vsel %vm168_vm4, %v167_v56, %v164_v28  ;;  %v163_v9 = vmul.f32 %v156_v4, %v2333_v63  ;;  %v1602_v28 = vld [vmem:[%s3635_s1 + $0x2c8] sm:$0xff]  ;;  %399 = vmatpush.msrb.mxu1 %v1575_v40  ;;  %v1572_v46 = vld [vmem:[%s3635_s1 + $0x1d8] sm:$0xff]  ;;  %v1571_v49 = vld [vmem:[%s3635_s1 + $0x1d0] sm:$0xff] }
 0x158   :  { %v176_v11 = vmul.f32 %v172_v8, %v2340_v5  ;;  %v1596_v47 = vld [vmem:[%s3635_s1 + $0x298] sm:$0xff]  ;;  %v1595_v51 = vld [vmem:[%s3635_s1 + $0x290] sm:$0xff]  ;;  %v1593_v55 = vld [vmem:[%s3635_s1 + $0x280] sm:$0xff] }
 0x159   :  { %277 = vmatmul.f32.gmra.mxu3 %v146_v32  ;;  %434 = vmatpush.msrb.mxu2 %v1585_v52  ;;  %v1604_v32 = vld [vmem:[%s3635_s1 + $0x2d8] sm:$0xff]  ;;  %v1570_v52 = vld [vmem:[%s3635_s1 + $0x1c8] sm:$0xff]  ;;  %v1567_v58 = vld [vmem:[%s3635_s1 + $0x1b0] sm:$0xff] }
 0x15a   :  { %460 = vmatpush.msrb.mxu3 %v1604_v32  ;;  %400 = vmatpush.msrb.mxu1 %v1574_v42  ;;  %v1568_v56 = vld [vmem:[%s3635_s1 + $0x1b8] sm:$0xff]  ;;  %v1566_v60 = vld [vmem:[%s3635_s1 + $0x1a8] sm:$0xff]  ;;  %v1565_v4 = vld [vmem:[%s3635_s1 + $0x1a0] sm:$0xff] }
 0x15b   :  { %435 = vmatpush.msrb.mxu2 %v1584_v13  ;;  %v1561_v32 = vld [vmem:[%s3635_s1 + $0x180] sm:$0xff] }
 0x15c   :  { %461 = vmatpush.msrb.mxu3 %v1603_v35  ;;  %401 = vmatpush.msrb.mxu1 %v1573_v44 }
 0x15d   :  { %436 = vmatpush.msrb.mxu2 %v1583_v17 }
 0x15e   :  { %248 = vmatmul.f32.gmra.mxu2 %v161_v53  ;;  %306 = vmatmul.f32.gmra.mxu0 %v174_v54  ;;  %v1594_v53 = vld [vmem:[%s3635_s1 + $0x288] sm:$0xff]  ;;  %v1569_v54 = vld [vmem:[%s3635_s1 + $0x1c0] sm:$0xff] }
 0x15f   :  { %462 = vmatpush.msrb.mxu3 %v1602_v28  ;;  %402 = vmatpush.msrb.mxu1 %v1572_v46 }
 0x161   :  { %280 = vmatmul.f32.gmra.mxu3 %v147_v34  ;;  %v1581_v34 = vld [vmem:[%s3635_s1 + $0x220] sm:$0xff]  ;;  %403 = vmatpush.msrb.mxu1 %v1571_v49 }
 0x162   :  { %463 = vmatpush.msrb.mxu3 %v1601_v30 }
 0x163   :  { %404 = vmatpush.msrb.mxu1 %v1570_v52 }
 0x164   :  { %464 = vmatpush.msrb.mxu3 %v1600_v38 }
 0x165   :  { %405 = vmatpush.msrb.mxu1 %v1569_v54 }
 0x166   :  { %251 = vmatmul.f32.gmra.mxu2 %v162_v61  ;;  %309 = vmatmul.f32.gmra.mxu0 %v175_v62  ;;  %v1817_v62 = vld [vmem:[%s3640_s2] ss:$0 sm:$0xff] }
 0x167   :  { %465 = vmatpush.msrb.mxu3 %v1599_v41  ;;  %406 = vmatpush.msrb.mxu1 %v1568_v56 }
 0x169   :  { %283 = vmatmul.f32.gmra.mxu3 %v2245_v22  ;;  %v1582_v22 = vld [vmem:[%s3635_s1 + $0x228] sm:$0xff]  ;;  %407 = vmatpush.msrb.mxu1 %v1567_v58 }
 0x16a   :  { %437 = vmatpush.msrb.mxu2 %v1582_v22  ;;  %466 = vmatpush.msrb.mxu3 %v1598_v43 }
 0x16b   :  { %408 = vmatpush.msrb.mxu1 %v1566_v60 }
 0x16c   :  { %438 = vmatpush.msrb.mxu2 %v1581_v34  ;;  %467 = vmatpush.msrb.mxu3 %v1597_v45 }
 0x16d   :  { %409 = vmatpush.msrb.mxu1 %v1565_v4 }
 0x16e   :  { %254 = vmatmul.f32.gmra.mxu2 %v163_v9  ;;  %312 = vmatmul.f32.gmra.mxu0 %v176_v11  ;;  %v1564_v9 = vld [vmem:[%s3635_s1 + $0x198] sm:$0xff] }
 0x16f   :  { %439 = vmatpush.msrb.mxu2 %v1580_v25  ;;  %468 = vmatpush.msrb.mxu3 %v1596_v47 }
 0x170   :  { %410 = vmatpush.msrb.mxu1 %v1564_v9 }
 0x171   :  { %440 = vmatpush.msrb.mxu2 %v1579_v29  ;;  %469 = vmatpush.msrb.mxu3 %v1595_v51 }
 0x172   :  { %411 = vmatpush.msrb.mxu1 %v1563_v15 }
 0x173   :  { %441 = vmatpush.msrb.mxu2 %v1578_v37  ;;  %470 = vmatpush.msrb.mxu3 %v1594_v53 }
 0x174   :  { %412 = vmatpush.msrb.mxu1 %v1562_v19  ;;  %v1818_v19 = vld [vmem:[%s3640_s2 + $0x1] ss:$0 sm:$0xff] }
 0x175   :  { %442 = vmatpush.msrb.mxu2 %v1577_v39  ;;  %471 = vmatpush.msrb.mxu3 %v1593_v55 }
 0x176   :  { %413 = vmatpush.msrb.mxu1 %v1561_v32 }
 0x178   :  { %536 = vmatpush.msra.mxu1 %v1931_v0 }
 0x17a   :  { %537 = vmatpush.msra.mxu1 %v1936_v1 }
 0x17c   :  { %538 = vmatpush.msra.mxu1 %v1943_v2 }
 0x17e   :  { %539 = vmatpush.msra.mxu1 %v1950_v3 }
 0x180   :  { %540 = vmatpush.msra.mxu1 %v1963_v6 }
 0x182   :  { %541 = vmatpush.msra.mxu1 %v1976_v10 }
 0x184   :  { %542 = vmatpush.msra.mxu1 %v1983_v12 }
 0x186   :  { %543 = vmatpush.msra.mxu1 %v1990_v14 }
 0x188   :  { %544 = vmatpush.msra.mxu1 %v1997_v16 }
 0x18a   :  { %545 = vmatpush.msra.mxu1 %v2004_v18 }
 0x18c   :  { %546 = vmatpush.msra.mxu1 %v2011_v20 }
 0x18e   :  { %547 = vmatpush.msra.mxu1 %v2018_v21 }
 0x190   :  { %548 = vmatpush.msra.mxu1 %v2025_v23 }
 0x192   :  { %549 = vmatpush.msra.mxu1 %v2032_v24 }
 0x194   :  { %550 = vmatpush.msra.mxu1 %v2039_v26 }
 0x196   :  { %551 = vmatpush.msra.mxu1 %v2046_v27 }
 0x1d3   :  { %v304_v8 = vpop.f32.mrf.mxu0 }
 0x1d4   :  { %v275_v61 = vpop.f32.mrf.mxu3 }
 0x1d9   :  { %v246_v11 = vpop.f32.mrf.mxu2 }
 0x1da   :  { %v247_v13 = vadd.f32 %v1817_v62, %v246_v11 }
 0x1db   :  { %v307_v25 = vpop.f32.mrf.mxu0 }
 0x1dc   :  { %v276_v17 = vadd.f32 %v275_v61, %v247_v13  ;;  %v278_v34 = vpop.f32.mrf.mxu3 }
 0x1de   :  { %v305_v22 = vadd.f32 %v304_v8, %v276_v17 }
 0x1e0   :  { %v2463_v35 = vmax.f32 %v305_v22, 0.0 }
 0x1e1   :  { %v249_v28 = vpop.f32.mrf.mxu2 }
 0x1e2   :  { %v250_v29 = vadd.f32 %v1817_v62, %v249_v28  ;;  %443 = vmatmul.f32.vlgmr.msrb.gmra.mxu2 %v2463_v35  ;;  %v332_v40 = vrot.slane %v2463_v35, 1  ;;  %v320_v53 = vrot.slane %v2463_v35, 7 }
 0x1e3   :  { %v310_v43 = vpop.f32.mrf.mxu0 }
 0x1e4   :  { %v279_v30 = vadd.f32 %v278_v34, %v250_v29  ;;  %v281_v38 = vpop.f32.mrf.mxu3 }
 0x1e6   :  { %v308_v36 = vadd.f32 %v307_v25, %v279_v30 }
 0x1e8   :  { %v317_v37 = vmax.f32 %v308_v36, 0.0 }
 0x1e9   :  { %v252_v39 = vpop.f32.mrf.mxu2 }
 0x1ea   :  { %v253_v41 = vadd.f32 %v1817_v62, %v252_v39  ;;  %v333_v42 = vrot.slane %v317_v37, 1  ;;  %446 = vmatmul.f32.gmra.mxu2 %v317_v37  ;;  %v321_v21 = vrot.slane %v317_v37, 7 }
 0x1eb   :  { %v313_v51 = vpop.f32.mrf.mxu0 }
 0x1ec   :  { %v282_v0 = vadd.f32 %v281_v38, %v253_v41  ;;  %v338_v1 = vsel %vm168_vm4, %v332_v40, %v333_v42  ;;  %v284_v47 = vpop.f32.mrf.mxu3  ;;  %v326_v23 = vsel %vm155_vm3, %v320_v53, %v321_v21 }
 0x1ed   :  { %v340_v2 = vmul.f32 %v338_v1, %v2268_v31  ;;  %v329_v60 = vmul.f32 %v326_v23, %v2296_v48 }
 0x1ee   :  { %v311_v44 = vadd.f32 %v310_v43, %v282_v0 }
 0x1ef   :  { %472 = vmatmul.f32.vlgmr.msrb.gmra.mxu3 %v340_v2 }
 0x1f0   :  { %v318_v3 = vmax.f32 %v311_v44, 0.0 }
 0x1f1   :  { %v255_v45 = vpop.f32.mrf.mxu2 }
 0x1f2   :  { %v256_v46 = vadd.f32 %v1817_v62, %v255_v45  ;;  %449 = vmatmul.f32.gmra.mxu2 %v318_v3  ;;  %v334_v6 = vrot.slane %v318_v3, 1  ;;  %v322_v61 = vrot.slane %v318_v3, 7 }
 0x1f4   :  { %v285_v49 = vadd.f32 %v284_v47, %v256_v46  ;;  %v337_v10 = vsel %vm168_vm4, %v333_v42, %v334_v6  ;;  %v325_v26 = vsel %vm155_vm3, %v321_v21, %v322_v61 }
 0x1f5   :  { %v341_v12 = vmul.f32 %v337_v10, %v2303_v50  ;;  %v330_v62 = vmul.f32 %v325_v26, %v2316_v57 }
 0x1f6   :  { %v314_v52 = vadd.f32 %v313_v51, %v285_v49 }
 0x1f7   :  { %475 = vmatmul.f32.gmra.mxu3 %v341_v12 }
 0x1f8   :  { %v319_v14 = vmax.f32 %v314_v52, 0.0 }
 0x1fa   :  { %v323_v16 = vrot.slane %v319_v14, 7  ;;  %452 = vmatmul.f32.gmra.mxu2 %v319_v14  ;;  %v335_v54 = vrot.slane %v319_v14, 1 }
 0x1fc   :  { %v327_v18 = vsel %vm155_vm3, %v323_v16, %v320_v53  ;;  %v336_v55 = vsel %vm168_vm4, %v334_v6, %v335_v54  ;;  %v339_v58 = vsel %vm168_vm4, %v335_v54, %v332_v40  ;;  %v324_v27 = vsel %vm155_vm3, %v322_v61, %v323_v16 }
 0x1fd   :  { %v328_v20 = vmul.f32 %v327_v18, %v2250_v33  ;;  %v342_v56 = vmul.f32 %v336_v55, %v2323_v59  ;;  %v343_v24 = vmul.f32 %v339_v58, %v2340_v5  ;;  %v331_v4 = vmul.f32 %v324_v27, %v2333_v63 }
 0x1ff   :  { %414 = vmatmul.f32.vlgmr.msrb.gmra.mxu1 %v328_v20  ;;  %478 = vmatmul.f32.gmra.mxu3 %v342_v56 }
 0x207   :  { %417 = vmatmul.f32.gmra.mxu1 %v329_v60  ;;  %481 = vmatmul.f32.gmra.mxu3 %v343_v24 }
 0x20f   :  { %420 = vmatmul.f32.gmra.mxu1 %v330_v62 }
 0x217   :  { %423 = vmatmul.f32.gmra.mxu1 %v331_v4 }
 0x265   :  { %v444_v8 = vpop.f32.mrf.mxu2 }
 0x26d   :  { %v447_v13 = vpop.f32.mrf.mxu2 }
 0x272   :  { %v473_v9 = vpop.f32.mrf.mxu3 }
 0x275   :  { %v450_v34 = vpop.f32.mrf.mxu2 }
 0x27a   :  { %v476_v15 = vpop.f32.mrf.mxu3 }
 0x27c   :  { %v415_v11 = vpop.f32.mrf.mxu1 }
 0x27d   :  { %v416_v32 = vadd.f32 %v1818_v19, %v415_v11  ;;  %v453_v43 = vpop.f32.mrf.mxu2  ;;  %v1643_v11 = vld [vmem:[%s3635_s1 + $0x3f8] sm:$0xff] }
 0x27e   :  { %694 = vmatpush.msra.mxu3 %v1643_v11 }
 0x27f   :  { %v445_v30 = vadd.f32 %v444_v8, %v416_v32  ;;  %v1626_v32 = vld [vmem:[%s3635_s1 + $0x370] sm:$0xff] }
 0x281   :  { %v474_v38 = vadd.f32 %v473_v9, %v445_v30  ;;  %v1624_v30 = vld [vmem:[%s3635_s1 + $0x360] sm:$0xff] }
 0x282   :  { %v479_v29 = vpop.f32.mrf.mxu3 }
 0x283   :  { %v485_v0 = vmax.f32 %v474_v38, 0.0  ;;  %v1623_v38 = vld [vmem:[%s3635_s1 + $0x358] sm:$0xff] }
 0x284   :  { %v418_v17 = vpop.f32.mrf.mxu1 }
 0x285   :  { %v419_v22 = vadd.f32 %v1818_v19, %v418_v17  ;;  %v1627_v17 = vld [vmem:[%s3635_s1 + $0x378] sm:$0xff] }
 0x286   :  { %665 = vmatpush.msra.mxu2 %v1627_v17 }
 0x287   :  { %v448_v25 = vadd.f32 %v447_v13, %v419_v22  ;;  %v1642_v13 = vld [vmem:[%s3635_s1 + $0x3f0] sm:$0xff]  ;;  %v1640_v22 = vld [vmem:[%s3635_s1 + $0x3e0] sm:$0xff] }
 0x288   :  { %695 = vmatpush.msra.mxu3 %v1642_v13  ;;  %666 = vmatpush.msra.mxu2 %v1626_v32  ;;  %v2692_v32 = vld [vmem:[%s3633_s5 + $0x60] sm:$0xff] }
 0x289   :  { %v477_v37 = vadd.f32 %v476_v15, %v448_v25  ;;  %v1641_v15 = vld [vmem:[%s3635_s1 + $0x3e8] sm:$0xff] }
 0x28a   :  { %v482_v44 = vpop.f32.mrf.mxu3  ;;  %696 = vmatpush.msra.mxu3 %v1641_v15  ;;  %v1625_v25 = vld [vmem:[%s3635_s1 + $0x368] sm:$0xff]  ;;  %v2680_v15 = vld [vmem:[%s3633_s5 + $0x70] sm:$0xff] }
 0x28b   :  { %v486_v41 = vmax.f32 %v477_v37, 0.0  ;;  %667 = vmatpush.msra.mxu2 %v1625_v25  ;;  %v1637_v37 = vld [vmem:[%s3635_s1 + $0x3c8] sm:$0xff] }
 0x28c   :  { %v421_v35 = vpop.f32.mrf.mxu1  ;;  %697 = vmatpush.msra.mxu3 %v1640_v22 }
 0x28d   :  { %v422_v28 = vadd.f32 %v1818_v19, %v421_v35  ;;  %v489_v3 = vadd.f32 %v486_v41, %v485_v0  ;;  %v1639_v35 = vld [vmem:[%s3635_s1 + $0x3d8] sm:$0xff]  ;;  %668 = vmatpush.msra.mxu2 %v1624_v30 }
 0x28e   :  { %698 = vmatpush.msra.mxu3 %v1639_v35  ;;  %v2698_v35 = vld [vmem:[%s3633_s5 + $0x58] sm:$0xff] }
 0x28f   :  { %v451_v36 = vadd.f32 %v450_v34, %v422_v28  ;;  %v1658_v34 = vld [vmem:[%s3635_s1 + $0x470] sm:$0xff]  ;;  %v1657_v28 = vld [vmem:[%s3635_s1 + $0x468] sm:$0xff]  ;;  %669 = vmatpush.msra.mxu2 %v1623_v38  ;;  %v2719_v38 = vld [vmem:[%s3633_s5 + $0x40] sm:$0xff] }
 0x291   :  { %v480_v39 = vadd.f32 %v479_v29, %v451_v36  ;;  %v1638_v29 = vld [vmem:[%s3635_s1 + $0x3d0] sm:$0xff]  ;;  %v1656_v36 = vld [vmem:[%s3635_s1 + $0x460] sm:$0xff] }
 0x292   :  { %699 = vmatpush.msra.mxu3 %v1638_v29  ;;  %v2707_v29 = vld [vmem:[%s3633_s5 + $0x50] sm:$0xff] }
 0x293   :  { %v487_v1 = vmax.f32 %v480_v39, 0.0  ;;  %v1655_v39 = vld [vmem:[%s3635_s1 + $0x458] sm:$0xff] }
 0x294   :  { %v424_v40 = vpop.f32.mrf.mxu1  ;;  %700 = vmatpush.msra.mxu3 %v1637_v37 }
 0x295   :  { %v425_v42 = vadd.f32 %v1818_v19, %v424_v40  ;;  %v490_v46 = vadd.f32 %v489_v3, %v487_v1  ;;  %v1659_v19 = vld [vmem:[%s3635_s1 + $0x478] sm:$0xff]  ;;  %v1636_v40 = vld [vmem:[%s3635_s1 + $0x3c0] sm:$0xff] }
 0x296   :  { %723 = vmatpush.msrb.mxu0 %v1659_v19  ;;  %701 = vmatpush.msra.mxu3 %v1636_v40  ;;  %v1652_v3 = vld [vmem:[%s3635_s1 + $0x440] sm:$0xff]  ;;  %v2686_v19 = vld [vmem:[%s3633_s5 + $0x68] sm:$0xff] }
 0x297   :  { %v454_v2 = vadd.f32 %v453_v43, %v425_v42  ;;  %v1654_v42 = vld [vmem:[%s3635_s1 + $0x450] sm:$0xff]  ;;  %v1635_v43 = vld [vmem:[%s3635_s1 + $0x3b8] sm:$0xff]  ;;  %v1819_v40 = vld [vmem:[%s3636_s4 + $0x1] ss:$0 sm:$0xff] }
 0x298   :  { %724 = vmatpush.msrb.mxu0 %v1658_v34  ;;  %702 = vmatpush.msra.mxu3 %v1635_v43 }
 0x299   :  { %v483_v45 = vadd.f32 %v482_v44, %v454_v2  ;;  %v1634_v2 = vld [vmem:[%s3635_s1 + $0x3b0] sm:$0xff]  ;;  %v1620_v44 = vld [vmem:[%s3635_s1 + $0x340] sm:$0xff] }
 0x29a   :  { %725 = vmatpush.msrb.mxu0 %v1657_v28  ;;  %703 = vmatpush.msra.mxu3 %v1634_v2  ;;  %v1610_v28 = vld [vmem:[%s3637_s3 + $0x1] sm:$0x1]  ;;  %v2738_v2 = vld [vmem:[%s3633_s5 + $0x30] sm:$0xff] }
 0x29b   :  { %v488_v6 = vmax.f32 %v483_v45, 0.0  ;;  %v1633_v45 = vld [vmem:[%s3635_s1 + $0x3a8] sm:$0xff] }
 0x29c   :  { %726 = vmatpush.msrb.mxu0 %v1656_v36  ;;  %704 = vmatpush.msra.mxu3 %v1633_v45  ;;  %v2713_v36 = vld [vmem:[%s3633_s5 + $0x48] sm:$0xff] }
 0x29d   :  { %v491_v47 = vadd.f32 %v490_v46, %v488_v6  ;;  %v1619_v46 = vld [vmem:[%s3635_s1 + $0x338] sm:$0xff] }
 0x29e   :  { %727 = vmatpush.msrb.mxu0 %v1655_v39 }
 0x29f   :  { %v492_v49 = vrot.slane %v491_v47, 4 }
 0x2a0   :  { %728 = vmatpush.msrb.mxu0 %v1654_v42 }
 0x2a1   :  { %v493_v10 = vadd.f32 %v492_v49, %v491_v47  ;;  %v1618_v47 = vld [vmem:[%s3635_s1 + $0x330] sm:$0xff]  ;;  %v1632_v49 = vld [vmem:[%s3635_s1 + $0x3a0] sm:$0xff] }
 0x2a2   :  { %705 = vmatpush.msra.mxu3 %v1632_v49 }
 0x2a3   :  { %v494_v51 = vrot.slane %v493_v10, 2 }
 0x2a5   :  { %v495_v12 = vadd.f32 %v494_v51, %v493_v10  ;;  %v1650_v10 = vld [vmem:[%s3635_s1 + $0x430] sm:$0xff]  ;;  %v1617_v51 = vld [vmem:[%s3635_s1 + $0x328] sm:$0xff] }
 0x2a7   :  { %v496_v52 = vrot.slane %v495_v12, 1 }
 0x2a9   :  { %v497_v14 = vadd.f32 %v496_v52, %v495_v12  ;;  %v1631_v12 = vld [vmem:[%s3635_s1 + $0x398] sm:$0xff]  ;;  %v1649_v52 = vld [vmem:[%s3635_s1 + $0x428] sm:$0xff] }
 0x2aa   :  { %706 = vmatpush.msra.mxu3 %v1631_v12  ;;  %v2778_v12 = vld [vmem:[%s3634_s0 + $0x10] sm:$0xff] }
 0x2ab   :  { %514 = vmatmul.f32.vlgmr.msra.gmra.mxu0 %v497_v14  ;;  %v1630_v14 = vld [vmem:[%s3635_s1 + $0x390] sm:$0xff] }
 0x2ac   :  { %707 = vmatpush.msra.mxu3 %v1630_v14  ;;  %v1690_v14 = vld [vmem:[%s3635_s1 + $0x568] sm:$0xff] }
 0x328   :  { %v515_v53 = vpop.f32.mrf.mxu0 }
 0x329   :  { %v518_v16 = vperm.slane %v515_v53, 0  ;;  %v1616_v53 = vld [vmem:[%s3635_s1 + $0x320] sm:$0xff] }
 0x32b   :  { %v2511_v54 = vsub.f32 %v485_v0, %v518_v16  ;;  %v2513_v18 = vsub.f32 %v486_v41, %v518_v16  ;;  %v2515_v55 = vsub.f32 %v487_v1, %v518_v16  ;;  %v2517_v20 = vsub.f32 %v488_v6, %v518_v16  ;;  %v1622_v41 = vld [vmem:[%s3635_s1 + $0x350] sm:$0xff]  ;;  %v1621_v0 = vld [vmem:[%s3635_s1 + $0x348] sm:$0xff]  ;;  %v1651_v6 = vld [vmem:[%s3635_s1 + $0x438] sm:$0xff] }
 0x32c   :  { %670 = vmatpush.msra.mxu2 %v1622_v41  ;;  %v1653_v1 = vld [vmem:[%s3635_s1 + $0x448] sm:$0xff]  ;;  %v1648_v16 = vld [vmem:[%s3635_s1 + $0x420] sm:$0xff]  ;;  %v2728_v41 = vld [vmem:[%s3633_s5 + $0x38] sm:$0xff] }
 0x32d   :  { %v523_v56 = vmul.f32 %v2511_v54, %v2511_v54  ;;  %v524_v21 = vmul.f32 %v2513_v18, %v2513_v18  ;;  %v525_v23 = vmul.f32 %v2515_v55, %v2515_v55  ;;  %v526_v60 = vmul.f32 %v2517_v20, %v2517_v20  ;;  %729 = vmatpush.msrb.mxu0 %v1653_v1 }
 0x32e   :  { %671 = vmatpush.msra.mxu2 %v1621_v0 }
 0x32f   :  { %v527_v58 = vadd.f32 %v524_v21, %v523_v56  ;;  %730 = vmatpush.msrb.mxu0 %v1652_v3  ;;  %v1629_v56 = vld [vmem:[%s3635_s1 + $0x388] sm:$0xff]  ;;  %v1615_v21 = vld [vmem:[%s3635_s1 + $0x318] sm:$0xff] }
 0x330   :  { %672 = vmatpush.msra.mxu2 %v1620_v44  ;;  %708 = vmatpush.msra.mxu3 %v1629_v56 }
 0x331   :  { %v528_v24 = vadd.f32 %v527_v58, %v525_v23  ;;  %731 = vmatpush.msrb.mxu0 %v1651_v6  ;;  %v1647_v23 = vld [vmem:[%s3635_s1 + $0x418] sm:$0xff]  ;;  %v1628_v58 = vld [vmem:[%s3635_s1 + $0x380] sm:$0xff] }
 0x332   :  { %673 = vmatpush.msra.mxu2 %v1619_v46  ;;  %709 = vmatpush.msra.mxu3 %v1628_v58 }
 0x333   :  { %v529_v61 = vadd.f32 %v528_v24, %v526_v60  ;;  %732 = vmatpush.msrb.mxu0 %v1650_v10  ;;  %v1614_v24 = vld [vmem:[%s3635_s1 + $0x310] sm:$0xff]  ;;  %v2772_v10 = vld [vmem:[%s3634_s0 + $0x8] sm:$0xff] }
 0x334   :  { %674 = vmatpush.msra.mxu2 %v1618_v47  ;;  %v2764_v47 = vld [vmem:[%s3634_s0 + $0x18] sm:$0xff] }
 0x335   :  { %v530_v26 = vrot.slane %v529_v61, 4  ;;  %733 = vmatpush.msrb.mxu0 %v1649_v52 }
 0x336   :  { %675 = vmatpush.msra.mxu2 %v1617_v51 }
 0x337   :  { %v531_v62 = vadd.f32 %v530_v26, %v529_v61  ;;  %734 = vmatpush.msrb.mxu0 %v1648_v16  ;;  %v1646_v61 = vld [vmem:[%s3635_s1 + $0x410] sm:$0xff]  ;;  %v2790_v16 = vld [vmem:[%s3633_s5 + $0x20] sm:$0xff] }
 0x338   :  { %676 = vmatpush.msra.mxu2 %v1616_v53  ;;  %v1708_v53 = vld [vmem:[%s3635_s1 + $0x5f8] sm:$0xff] }
 0x339   :  { %v532_v27 = vrot.slane %v531_v62, 2  ;;  %735 = vmatpush.msrb.mxu0 %v1647_v23  ;;  %892 = vmatpush.msrb.mxu3 %v1708_v53  ;;  %v1678_v53 = vld [vmem:[%s3635_s1 + $0x508] sm:$0xff] }
 0x33a   :  { %677 = vmatpush.msra.mxu2 %v1615_v21 }
 0x33b   :  { %v533_v4 = vadd.f32 %v532_v27, %v531_v62  ;;  %v1613_v62 = vld [vmem:[%s3635_s1 + $0x308] sm:$0xff]  ;;  %736 = vmatpush.msrb.mxu0 %v1646_v61  ;;  %v2806_v61 = vld [vmem:[%s3633_s5 + $0x18] sm:$0xff] }
 0x33c   :  { %v1645_v27 = vld [vmem:[%s3635_s1 + $0x408] sm:$0xff]  ;;  %678 = vmatpush.msra.mxu2 %v1614_v24  ;;  %v1689_v24 = vld [vmem:[%s3635_s1 + $0x560] sm:$0xff] }
 0x33d   :  { %v534_v8 = vrot.slane %v533_v4, 1  ;;  %737 = vmatpush.msrb.mxu0 %v1645_v27 }
 0x33e   :  { %679 = vmatpush.msra.mxu2 %v1613_v62 }
 0x33f   :  { %v535_v9 = vadd.f32 %v534_v8, %v533_v4  ;;  %v1612_v4 = vld [vmem:[%s3635_s1 + $0x300] sm:$0xff] }
 0x340   :  { %v1644_v8 = vld [vmem:[%s3635_s1 + $0x400] sm:$0xff]  ;;  %680 = vmatpush.msra.mxu2 %v1612_v4 }
 0x341   :  { %552 = vmatmul.f32.vlgmr.msra.gmra.mxu1 %v535_v9  ;;  %738 = vmatpush.msrb.mxu0 %v1644_v8  ;;  %v2674_v9 = vld [vmem:[%s3633_s5 + $0x78] sm:$0xff] }
 0x342   :  { %v1688_v8 = vld [vmem:[%s3635_s1 + $0x558] sm:$0xff] }
 0x343   :  { %934 = vmatpush.msra.mxu0 %v2674_v9 }
 0x345   :  { %935 = vmatpush.msra.mxu0 %v2680_v15 }
 0x347   :  { %936 = vmatpush.msra.mxu0 %v2686_v19 }
 0x349   :  { %937 = vmatpush.msra.mxu0 %v2692_v32 }
 0x34b   :  { %938 = vmatpush.msra.mxu0 %v2698_v35 }
 0x34d   :  { %939 = vmatpush.msra.mxu0 %v2707_v29 }
 0x34f   :  { %940 = vmatpush.msra.mxu0 %v2713_v36 }
 0x351   :  { %941 = vmatpush.msra.mxu0 %v2719_v38 }
 0x353   :  { %942 = vmatpush.msra.mxu0 %v2728_v41 }
 0x355   :  { %943 = vmatpush.msra.mxu0 %v2738_v2 }
 0x3be   :  { %v553_v60 = vpop.f32.mrf.mxu1 }
 0x3bf   :  { %v554_v26 = vadd.f32 1e-05, %v553_v60  ;;  %v1707_v60 = vld [vmem:[%s3635_s1 + $0x5f0] sm:$0xff] }
 0x3c0   :  { %893 = vmatpush.msrb.mxu3 %v1707_v60  ;;  %v1699_v60 = vld [vmem:[%s3635_s1 + $0x5b0] sm:$0xff] }
 0x3c1   :  { %1827 = vrsqrt.f32 %v554_v26  ;;  %vm562_vm6 = vweird.f32 %v554_v26 }
 0x3c7   :  { %v1828_v11 = vpop.eup %1827 }
 0x3c8   :  { %v557_v13 = vmul.f32 %v1828_v11, %v554_v26  ;;  %vm563_vm5 = vweird.f32 %v1828_v11 }
 0x3c9   :  { %vm564_vm7 = vmor %vm562_vm6, %vm563_vm5 }
 0x3ca   :  { %v558_v17 = vmul.f32 %v1828_v11, %v557_v13 }
 0x3cc   :  { %v559_v22 = vmul.f32 0.5, %v558_v17  ;;  %v1687_v17 = vld [vmem:[%s3635_s1 + $0x550] sm:$0xff] }
 0x3ce   :  { %v560_v34 = vsub.f32 1.5, %v559_v22 }
 0x3d0   :  { %v561_v25 = vmul.f32 %v1828_v11, %v560_v34 }
 0x3d2   :  { %v565_v30 = vsel %vm564_vm7, %v1828_v11, %v561_v25  ;;  %v1685_v25 = vld [vmem:[%s3635_s1 + $0x540] sm:$0xff] }
 0x3d3   :  { %v568_v37 = vmul.f32 %v1610_v28, %v565_v30  ;;  %v2840_v28 = vld [vmem:[%s3633_s5 + $0x8] sm:$0xff] }
 0x3d5   :  { %v569_v39 = vperm.slane %v568_v37, 0 }
 0x3d7   :  { %v571_v42 = vmul.f32 %v569_v39, %v2513_v18  ;;  %v573_v43 = vmul.f32 %v569_v39, %v2517_v20  ;;  %v570_v0 = vmul.f32 %v569_v39, %v2511_v54  ;;  %v572_v1 = vmul.f32 %v569_v39, %v2515_v55  ;;  %v1692_v18 = vld [vmem:[%s3635_s1 + $0x578] sm:$0xff]  ;;  %v1691_v54 = vld [vmem:[%s3635_s1 + $0x570] sm:$0xff]  ;;  %v2750_v55 = vld [vmem:[%s3633_s5 + $0x28] sm:$0xff] }
 0x3d8   :  { %944 = vmatpush.msra.mxu0 %v2750_v55  ;;  %v2756_v20 = vld [vmem:[%s3634_s0] sm:$0xff]  ;;  %863 = vmatpush.msrb.mxu2 %v1692_v18  ;;  %v1704_v18 = vld [vmem:[%s3635_s1 + $0x5d8] sm:$0xff] }
 0x3d9   :  { %v579_v44 = vadd.f32 %v1819_v40, %v570_v0  ;;  %v582_v3 = vadd.f32 %v1819_v40, %v573_v43  ;;  %v580_v45 = vadd.f32 %v1819_v40, %v571_v42  ;;  %v581_v46 = vadd.f32 %v1819_v40, %v572_v1  ;;  %v2848_v39 = vld [vmem:[%s3633_s5] sm:$0xff] }
 0x3da   :  { %945 = vmatpush.msra.mxu0 %v2790_v16  ;;  %864 = vmatpush.msrb.mxu2 %v1691_v54  ;;  %v1681_v54 = vld [vmem:[%s3635_s1 + $0x520] sm:$0xff] }
 0x3db   :  { %v2759_v6 = vadd.f32 %v2756_v20, %v579_v44  ;;  %v2767_v49 = vadd.f32 %v2764_v47, %v582_v3  ;;  %v584_v51 = vadd.f32 %v2772_v10, %v580_v45  ;;  %v585_v52 = vadd.f32 %v2778_v12, %v581_v46  ;;  %v1683_v46 = vld [vmem:[%s3635_s1 + $0x530] sm:$0xff] }
 0x3dc   :  { %946 = vmatpush.msra.mxu0 %v2806_v61  ;;  %865 = vmatpush.msrb.mxu2 %v1690_v14  ;;  %v1701_v14 = vld [vmem:[%s3635_s1 + $0x5c0] sm:$0xff] }
 0x3dd   :  { %v587_v56 = vrot.slane %v2759_v6, 7  ;;  %v599_v21 = vrot.slane %v2759_v6, 1  ;;  %710 = vmatmul.f32.vlgmr.msra.gmra.mxu3 %v2759_v6  ;;  %v590_v23 = vrot.slane %v2767_v49, 7  ;;  %v600_v58 = vrot.slane %v584_v51, 1  ;;  %v1703_v6 = vld [vmem:[%s3635_s1 + $0x5d0] sm:$0xff] }
 0x3de   :  { %v588_v11 = vrot.slane %v584_v51, 7  ;;  %v601_v13 = vrot.slane %v585_v52, 1  ;;  %866 = vmatpush.msrb.mxu2 %v1689_v24  ;;  %v589_v40 = vrot.slane %v585_v52, 7  ;;  %v602_v42 = vrot.slane %v2767_v49, 1  ;;  %v1674_v24 = vld [vmem:[%s3635_s1 + $0x4e8] sm:$0xff] }
 0x3df   :  { %v594_v26 = vsel %vm155_vm3, %v590_v23, %v587_v56  ;;  %v605_v62 = vsel %vm168_vm4, %v599_v21, %v600_v58 }
 0x3e0   :  { %v595_v27 = vmul.f32 %v594_v26, %v2250_v33  ;;  %v607_v4 = vmul.f32 %v605_v62, %v2268_v31  ;;  %867 = vmatpush.msrb.mxu2 %v1688_v8  ;;  %v2824_v33 = vld [vmem:[%s3633_s5 + $0x10] sm:$0xff]  ;;  %v1686_v31 = vld [vmem:[%s3635_s1 + $0x548] sm:$0xff]  ;;  %v593_v22 = vsel %vm155_vm3, %v587_v56, %v588_v11  ;;  %v604_v34 = vsel %vm168_vm4, %v600_v58, %v601_v13  ;;  %v1676_v56 = vld [vmem:[%s3635_s1 + $0x4f8] sm:$0xff] }
 0x3e1   :  { %947 = vmatpush.msra.mxu0 %v2824_v33  ;;  %v596_v30 = vmul.f32 %v593_v22, %v2296_v48  ;;  %v608_v37 = vmul.f32 %v604_v34, %v2303_v50  ;;  %v592_v43 = vsel %vm155_vm3, %v588_v11, %v589_v40  ;;  %v603_v48 = vsel %vm168_vm4, %v601_v13, %v602_v42  ;;  %v1675_v58 = vld [vmem:[%s3635_s1 + $0x4f0] sm:$0xff]  ;;  %v1698_v26 = vld [vmem:[%s3635_s1 + $0x5a8] sm:$0xff]  ;;  %v1673_v62 = vld [vmem:[%s3635_s1 + $0x4e0] sm:$0xff] }
 0x3e2   :  { %681 = vmatmul.f32.vlgmr.msra.gmra.mxu2 %v595_v27  ;;  %739 = vmatmul.f32.vlgmr.msrb.gmra.mxu0 %v607_v4  ;;  %v597_v50 = vmul.f32 %v592_v43, %v2316_v57  ;;  %v609_v0 = vmul.f32 %v603_v48, %v2323_v59  ;;  %v591_v1 = vsel %vm155_vm3, %v589_v40, %v590_v23  ;;  %v1684_v57 = vld [vmem:[%s3635_s1 + $0x538] sm:$0xff]  ;;  %v1706_v59 = vld [vmem:[%s3635_s1 + $0x5e8] sm:$0xff]  ;;  %v1677_v23 = vld [vmem:[%s3635_s1 + $0x500] sm:$0xff] }
 0x3e3   :  { %868 = vmatpush.msrb.mxu2 %v1687_v17  ;;  %948 = vmatpush.msra.mxu0 %v2840_v28  ;;  %v606_v44 = vsel %vm168_vm4, %v602_v42, %v599_v21  ;;  %v598_v3 = vmul.f32 %v591_v1, %v2333_v63  ;;  %v1705_v63 = vld [vmem:[%s3635_s1 + $0x5e0] sm:$0xff]  ;;  %v1700_v21 = vld [vmem:[%s3635_s1 + $0x5b8] sm:$0xff]  ;;  %v1671_v11 = vld [vmem:[%s3635_s1 + $0x4d0] sm:$0xff] }
 0x3e4   :  { %v610_v45 = vmul.f32 %v606_v44, %v2340_v5  ;;  %894 = vmatpush.msrb.mxu3 %v1706_v59  ;;  %v1682_v5 = vld [vmem:[%s3635_s1 + $0x528] sm:$0xff]  ;;  %834 = vmatpush.msrb.mxu1 %v1676_v56  ;;  %v1697_v27 = vld [vmem:[%s3635_s1 + $0x5a0] sm:$0xff]  ;;  %v1672_v4 = vld [vmem:[%s3635_s1 + $0x4d8] sm:$0xff] }
 0x3e5   :  { %713 = vmatmul.f32.gmra.mxu3 %v584_v51  ;;  %869 = vmatpush.msrb.mxu2 %v1686_v31  ;;  %v1702_v51 = vld [vmem:[%s3635_s1 + $0x5c8] sm:$0xff]  ;;  %v1696_v8 = vld [vmem:[%s3635_s1 + $0x598] sm:$0xff]  ;;  %v1695_v13 = vld [vmem:[%s3635_s1 + $0x590] sm:$0xff] }
 0x3e6   :  { %949 = vmatpush.msra.mxu0 %v2848_v39  ;;  %895 = vmatpush.msrb.mxu3 %v1705_v63  ;;  %v1670_v17 = vld [vmem:[%s3635_s1 + $0x4c8] sm:$0xff]  ;;  %v1669_v22 = vld [vmem:[%s3635_s1 + $0x4c0] sm:$0xff]  ;;  %v1663_v44 = vld [vmem:[%s3635_s1 + $0x490] sm:$0xff] }
 0x3e7   :  { %870 = vmatpush.msrb.mxu2 %v1685_v25  ;;  %835 = vmatpush.msrb.mxu1 %v1675_v58  ;;  %v1694_v31 = vld [vmem:[%s3635_s1 + $0x588] sm:$0xff]  ;;  %v1693_v34 = vld [vmem:[%s3635_s1 + $0x580] sm:$0xff]  ;;  %v1668_v25 = vld [vmem:[%s3635_s1 + $0x4b8] sm:$0xff] }
 0x3e8   :  { %896 = vmatpush.msrb.mxu3 %v1704_v18  ;;  %v1820_v42 = vld [vmem:[%s3640_s2 + $0x2] ss:$0 sm:$0xff] }
 0x3e9   :  { %871 = vmatpush.msrb.mxu2 %v1684_v57  ;;  %836 = vmatpush.msrb.mxu1 %v1674_v24  ;;  %v1665_v43 = vld [vmem:[%s3635_s1 + $0x4a0] sm:$0xff] }
 0x3ea   :  { %684 = vmatmul.f32.gmra.mxu2 %v596_v30  ;;  %742 = vmatmul.f32.gmra.mxu0 %v608_v37  ;;  %v1667_v30 = vld [vmem:[%s3635_s1 + $0x4b0] sm:$0xff]  ;;  %v1666_v37 = vld [vmem:[%s3635_s1 + $0x4a8] sm:$0xff]  ;;  %v1661_v59 = vld [vmem:[%s3635_s1 + $0x480] sm:$0xff] }
 0x3eb   :  { %872 = vmatpush.msrb.mxu2 %v1683_v46  ;;  %897 = vmatpush.msrb.mxu3 %v1703_v6  ;;  %v3001_v24 = vld [vmem:[%s3639_s7] sm:$0xff] }
 0x3ec   :  { %837 = vmatpush.msrb.mxu1 %v1673_v62 }
 0x3ed   :  { %716 = vmatmul.f32.gmra.mxu3 %v585_v52  ;;  %873 = vmatpush.msrb.mxu2 %v1682_v5  ;;  %v1679_v52 = vld [vmem:[%s3635_s1 + $0x510] sm:$0xff] }
 0x3ee   :  { %898 = vmatpush.msrb.mxu3 %v1702_v51  ;;  %838 = vmatpush.msrb.mxu1 %v1672_v4 }
 0x3ef   :  { %874 = vmatpush.msrb.mxu2 %v1681_v54 }
 0x3f0   :  { %899 = vmatpush.msrb.mxu3 %v1701_v14  ;;  %839 = vmatpush.msrb.mxu1 %v1671_v11 }
 0x3f2   :  { %687 = vmatmul.f32.gmra.mxu2 %v597_v50  ;;  %745 = vmatmul.f32.gmra.mxu0 %v609_v0  ;;  %v1664_v50 = vld [vmem:[%s3635_s1 + $0x498] sm:$0xff] }
 0x3f3   :  { %900 = vmatpush.msrb.mxu3 %v1700_v21  ;;  %840 = vmatpush.msrb.mxu1 %v1670_v17 }
 0x3f5   :  { %719 = vmatmul.f32.gmra.mxu3 %v2767_v49  ;;  %v1680_v49 = vld [vmem:[%s3635_s1 + $0x518] sm:$0xff]  ;;  %841 = vmatpush.msrb.mxu1 %v1669_v22 }
 0x3f6   :  { %875 = vmatpush.msrb.mxu2 %v1680_v49  ;;  %901 = vmatpush.msrb.mxu3 %v1699_v60 }
 0x3f7   :  { %842 = vmatpush.msrb.mxu1 %v1668_v25 }
 0x3f8   :  { %876 = vmatpush.msrb.mxu2 %v1679_v52  ;;  %902 = vmatpush.msrb.mxu3 %v1698_v26 }
 0x3f9   :  { %843 = vmatpush.msrb.mxu1 %v1667_v30 }
 0x3fa   :  { %690 = vmatmul.f32.gmra.mxu2 %v598_v3  ;;  %748 = vmatmul.f32.gmra.mxu0 %v610_v45  ;;  %v1662_v45 = vld [vmem:[%s3635_s1 + $0x488] sm:$0xff] }
 0x3fb   :  { %877 = vmatpush.msrb.mxu2 %v1678_v53  ;;  %903 = vmatpush.msrb.mxu3 %v1697_v27 }
 0x3fc   :  { %844 = vmatpush.msrb.mxu1 %v1666_v37 }
 0x3fd   :  { %878 = vmatpush.msrb.mxu2 %v1677_v23  ;;  %904 = vmatpush.msrb.mxu3 %v1696_v8 }
 0x3fe   :  { %845 = vmatpush.msrb.mxu1 %v1665_v43 }
 0x3ff   :  { %905 = vmatpush.msrb.mxu3 %v1695_v13 }
 0x400   :  { %846 = vmatpush.msrb.mxu1 %v1664_v50 }
 0x401   :  { %906 = vmatpush.msrb.mxu3 %v1694_v31 }
 0x402   :  { %847 = vmatpush.msrb.mxu1 %v1663_v44  ;;  %v3034_v44 = vld [vmem:[%s3639_s7 + $0x10] sm:$0xff] }
 0x403   :  { %907 = vmatpush.msrb.mxu3 %v1693_v34  ;;  %v3013_v34 = vld [vmem:[%s3639_s7 + $0x8] sm:$0xff] }
 0x404   :  { %848 = vmatpush.msrb.mxu1 %v1662_v45 }
 0x406   :  { %849 = vmatpush.msrb.mxu1 %v1661_v59 }
 0x408   :  { %972 = vmatpush.msra.mxu1 %v2674_v9 }
 0x40a   :  { %973 = vmatpush.msra.mxu1 %v2680_v15 }
 0x40c   :  { %974 = vmatpush.msra.mxu1 %v2686_v19 }
 0x40e   :  { %975 = vmatpush.msra.mxu1 %v2692_v32 }
 0x410   :  { %976 = vmatpush.msra.mxu1 %v2698_v35 }
 0x412   :  { %977 = vmatpush.msra.mxu1 %v2707_v29 }
 0x414   :  { %978 = vmatpush.msra.mxu1 %v2713_v36 }
 0x416   :  { %979 = vmatpush.msra.mxu1 %v2719_v38 }
 0x418   :  { %980 = vmatpush.msra.mxu1 %v2728_v41 }
 0x41a   :  { %981 = vmatpush.msra.mxu1 %v2738_v2 }
 0x41c   :  { %982 = vmatpush.msra.mxu1 %v2750_v55 }
 0x41e   :  { %983 = vmatpush.msra.mxu1 %v2790_v16 }
 0x420   :  { %984 = vmatpush.msra.mxu1 %v2806_v61 }
 0x422   :  { %985 = vmatpush.msra.mxu1 %v2824_v33 }
 0x424   :  { %986 = vmatpush.msra.mxu1 %v2840_v28 }
 0x426   :  { %987 = vmatpush.msra.mxu1 %v2848_v39 }
 0x45f   :  { %v740_v48 = vpop.f32.mrf.mxu0 }
 0x460   :  { %v711_v40 = vpop.f32.mrf.mxu3 }
 0x465   :  { %v682_v0 = vpop.f32.mrf.mxu2 }
 0x466   :  { %v683_v1 = vadd.f32 %v1820_v42, %v682_v0  ;;  %v3028_v0 = vld [vmem:[%s3638_s6] sm:$0xff] }
 0x467   :  { %v743_v5 = vpop.f32.mrf.mxu0 }
 0x468   :  { %v712_v3 = vadd.f32 %v711_v40, %v683_v1  ;;  %v714_v46 = vpop.f32.mrf.mxu3 }
 0x46a   :  { %v741_v57 = vadd.f32 %v740_v48, %v712_v3 }
 0x46c   :  { %v2982_v63 = vmax.f32 %v741_v57, 0.0 }
 0x46d   :  { %v685_v18 = vpop.f32.mrf.mxu2 }
 0x46e   :  { %v686_v54 = vadd.f32 %v1820_v42, %v685_v18  ;;  %879 = vmatmul.f32.vlgmr.msrb.gmra.mxu2 %v2982_v63  ;;  %v768_v53 = vrot.slane %v2982_v63, 1  ;;  %v756_v40 = vrot.slane %v2982_v63, 7 }
 0x46f   :  { %v746_v23 = vpop.f32.mrf.mxu0 }
 0x470   :  { %v715_v6 = vadd.f32 %v714_v46, %v686_v54  ;;  %v717_v52 = vpop.f32.mrf.mxu3  ;;  %v3047_v46 = vld [vmem:[%s3638_s6 + $0x8] sm:$0xff] }
 0x472   :  { %v744_v49 = vadd.f32 %v743_v5, %v715_v6  ;;  %v3053_v5 = vld [vmem:[%s3639_s7 + $0x18] sm:$0xff] }
 0x474   :  { %v2988_v51 = vmax.f32 %v744_v49, 0.0  ;;  %v3061_v49 = vld [vmem:[%s3638_s6 + $0x10] sm:$0xff] }
 0x475   :  { %v688_v14 = vpop.f32.mrf.mxu2 }
 0x476   :  { %v689_v56 = vadd.f32 %v1820_v42, %v688_v14  ;;  %v769_v21 = vrot.slane %v2988_v51, 1  ;;  %882 = vmatmul.f32.gmra.mxu2 %v2988_v51  ;;  %v757_v45 = vrot.slane %v2988_v51, 7  ;;  %v3069_v14 = vld [vmem:[%s3638_s6 + $0x18] sm:$0xff] }
 0x477   :  { %v749_v22 = vpop.f32.mrf.mxu0 }
 0x478   :  { %v718_v58 = vadd.f32 %v717_v52, %v689_v56  ;;  %v774_v60 = vsel %vm168_vm4, %v768_v53, %v769_v21  ;;  %v720_v13 = vpop.f32.mrf.mxu3  ;;  %v762_v57 = vsel %vm155_vm3, %v756_v40, %v757_v45 }
 0x479   :  { %v776_v26 = vmul.f32 %v3001_v24, %v774_v60  ;;  %v765_v63 = vmul.f32 %v3047_v46, %v762_v57 }
 0x47a   :  { %v747_v62 = vadd.f32 %v746_v23, %v718_v58 }
 0x47b   :  { %908 = vmatmul.f32.vlgmr.msrb.gmra.mxu3 %v776_v26 }
 0x47c   :  { %v754_v27 = vmax.f32 %v747_v62, 0.0  ;;  %v1821_v62 = vld [vmem:[%s3640_s2 + $0x3] ss:$0 sm:$0xff] }
 0x47d   :  { %v691_v4 = vpop.f32.mrf.mxu2 }
 0x47e   :  { %v692_v8 = vadd.f32 %v1820_v42, %v691_v4  ;;  %885 = vmatmul.f32.gmra.mxu2 %v754_v27  ;;  %v770_v11 = vrot.slane %v754_v27, 1  ;;  %v758_v54 = vrot.slane %v754_v27, 7 }
 0x480   :  { %v721_v17 = vadd.f32 %v720_v13, %v692_v8  ;;  %v773_v31 = vsel %vm168_vm4, %v769_v21, %v770_v11  ;;  %v761_v6 = vsel %vm155_vm3, %v757_v45, %v758_v54 }
 0x481   :  { %v777_v25 = vmul.f32 %v3013_v34, %v773_v31  ;;  %v766_v51 = vmul.f32 %v3061_v49, %v761_v6 }
 0x482   :  { %v750_v30 = vadd.f32 %v749_v22, %v721_v17 }
 0x483   :  { %911 = vmatmul.f32.gmra.mxu3 %v777_v25 }
 0x484   :  { %v755_v37 = vmax.f32 %v750_v30, 0.0 }
 0x486   :  { %v759_v42 = vrot.slane %v755_v37, 7  ;;  %888 = vmatmul.f32.gmra.mxu2 %v755_v37  ;;  %v771_v43 = vrot.slane %v755_v37, 1 }
 0x488   :  { %v763_v48 = vsel %vm155_vm3, %v759_v42, %v756_v40  ;;  %v772_v50 = vsel %vm168_vm4, %v770_v11, %v771_v43  ;;  %v775_v59 = vsel %vm168_vm4, %v771_v43, %v768_v53  ;;  %v760_v52 = vsel %vm155_vm3, %v758_v54, %v759_v42 }
 0x489   :  { %v764_v1 = vmul.f32 %v3028_v0, %v763_v48  ;;  %v778_v3 = vmul.f32 %v3034_v44, %v772_v50  ;;  %v779_v18 = vmul.f32 %v3053_v5, %v775_v59  ;;  %v767_v53 = vmul.f32 %v3069_v14, %v760_v52 }
 0x48b   :  { %850 = vmatmul.f32.vlgmr.msrb.gmra.mxu1 %v764_v1  ;;  %914 = vmatmul.f32.gmra.mxu3 %v778_v3 }
 0x493   :  { %853 = vmatmul.f32.gmra.mxu1 %v765_v63  ;;  %917 = vmatmul.f32.gmra.mxu3 %v779_v18 }
 0x49b   :  { %856 = vmatmul.f32.gmra.mxu1 %v766_v51 }
 0x4a3   :  { %859 = vmatmul.f32.gmra.mxu1 %v767_v53 }
 0x4f1   :  { %v880_v56 = vpop.f32.mrf.mxu2 }
 0x4f9   :  { %v883_v58 = vpop.f32.mrf.mxu2 }
 0x4fe   :  { %v909_v21 = vpop.f32.mrf.mxu3 }
 0x501   :  { %v886_v8 = vpop.f32.mrf.mxu2 }
 0x506   :  { %v912_v60 = vpop.f32.mrf.mxu3 }
 0x508   :  { %v851_v23 = vpop.f32.mrf.mxu1 }
 0x509   :  { %v852_v4 = vadd.f32 %v1821_v62, %v851_v23  ;;  %v889_v50 = vpop.f32.mrf.mxu2 }
 0x50b   :  { %v881_v22 = vadd.f32 %v880_v56, %v852_v4 }
 0x50d   :  { %v910_v37 = vadd.f32 %v909_v21, %v881_v22 }
 0x50e   :  { %v915_v31 = vpop.f32.mrf.mxu3 }
 0x50f   :  { %v921_v1 = vmax.f32 %v910_v37, 0.0 }
 0x510   :  { %v854_v26 = vpop.f32.mrf.mxu1 }
 0x511   :  { %v855_v27 = vadd.f32 %v1821_v62, %v854_v26 }
 0x513   :  { %v884_v13 = vadd.f32 %v883_v58, %v855_v27 }
 0x515   :  { %v913_v30 = vadd.f32 %v912_v60, %v884_v13 }
 0x516   :  { %v918_v57 = vpop.f32.mrf.mxu3 }
 0x517   :  { %v922_v43 = vmax.f32 %v913_v30, 0.0 }
 0x518   :  { %v857_v11 = vpop.f32.mrf.mxu1 }
 0x519   :  { %v858_v17 = vadd.f32 %v1821_v62, %v857_v11  ;;  %v925_v59 = vadd.f32 %v922_v43, %v921_v1 }
 0x51b   :  { %v887_v25 = vadd.f32 %v886_v8, %v858_v17 }
 0x51d   :  { %v916_v40 = vadd.f32 %v915_v31, %v887_v25 }
 0x51f   :  { %v923_v3 = vmax.f32 %v916_v40, 0.0 }
 0x520   :  { %v860_v42 = vpop.f32.mrf.mxu1 }
 0x521   :  { %v861_v48 = vadd.f32 %v1821_v62, %v860_v42  ;;  %v926_v18 = vadd.f32 %v925_v59, %v923_v3  ;;  %v1740_v59 = vld [vmem:[%s3635_s1 + $0x6e0] sm:$0xff] }
 0x523   :  { %v890_v45 = vadd.f32 %v889_v50, %v861_v48  ;;  %v1743_v50 = vld [vmem:[%s3635_s1 + $0x6f8] sm:$0xff] }
 0x524   :  { %1130 = vmatpush.msra.mxu3 %v1743_v50  ;;  %v1750_v50 = vld [vmem:[%s3635_s1 + $0x730] sm:$0xff] }
 0x525   :  { %v919_v63 = vadd.f32 %v918_v57, %v890_v45  ;;  %v1727_v45 = vld [vmem:[%s3635_s1 + $0x678] sm:$0xff] }
 0x526   :  { %v1759_v57 = vld [vmem:[%s3635_s1 + $0x778] sm:$0xff]  ;;  %1101 = vmatpush.msra.mxu2 %v1727_v45  ;;  %v1749_v45 = vld [vmem:[%s3635_s1 + $0x728] sm:$0xff] }
 0x527   :  { %v924_v54 = vmax.f32 %v919_v63, 0.0  ;;  %1159 = vmatpush.msrb.mxu0 %v1759_v57  ;;  %v1726_v63 = vld [vmem:[%s3635_s1 + $0x670] sm:$0xff] }
 0x528   :  { %1102 = vmatpush.msra.mxu2 %v1726_v63  ;;  %v1730_v57 = vld [vmem:[%s3635_s1 + $0x690] sm:$0xff]  ;;  %v1748_v63 = vld [vmem:[%s3635_s1 + $0x720] sm:$0xff] }
 0x529   :  { %v927_v6 = vadd.f32 %v926_v18, %v924_v54  ;;  %v1758_v18 = vld [vmem:[%s3635_s1 + $0x770] sm:$0xff] }
 0x52a   :  { %1160 = vmatpush.msrb.mxu0 %v1758_v18  ;;  %v1729_v18 = vld [vmem:[%s3635_s1 + $0x688] sm:$0xff] }
 0x52b   :  { %v928_v51 = vrot.slane %v927_v6, 4 }
 0x52d   :  { %v929_v52 = vadd.f32 %v928_v51, %v927_v6  ;;  %v1725_v6 = vld [vmem:[%s3635_s1 + $0x668] sm:$0xff] }
 0x52e   :  { %v1757_v51 = vld [vmem:[%s3635_s1 + $0x768] sm:$0xff]  ;;  %1103 = vmatpush.msra.mxu2 %v1725_v6  ;;  %v1747_v6 = vld [vmem:[%s3635_s1 + $0x718] sm:$0xff] }
 0x52f   :  { %v930_v53 = vrot.slane %v929_v52, 2  ;;  %1161 = vmatpush.msrb.mxu0 %v1757_v51  ;;  %v1728_v51 = vld [vmem:[%s3635_s1 + $0x680] sm:$0xff] }
 0x531   :  { %v931_v56 = vadd.f32 %v930_v53, %v929_v52  ;;  %v1738_v52 = vld [vmem:[%s3635_s1 + $0x6d0] sm:$0xff]  ;;  %v1724_v53 = vld [vmem:[%s3635_s1 + $0x660] sm:$0xff] }
 0x532   :  { %1104 = vmatpush.msra.mxu2 %v1724_v53  ;;  %v1714_v53 = vld [vmem:[%s3635_s1 + $0x610] sm:$0xff] }
 0x533   :  { %v932_v23 = vrot.slane %v931_v56, 1 }
 0x535   :  { %v933_v21 = vadd.f32 %v932_v23, %v931_v56  ;;  %v1756_v56 = vld [vmem:[%s3635_s1 + $0x760] sm:$0xff]  ;;  %v1737_v23 = vld [vmem:[%s3635_s1 + $0x6c8] sm:$0xff] }
 0x536   :  { %1162 = vmatpush.msrb.mxu0 %v1756_v56  ;;  %v1746_v56 = vld [vmem:[%s3635_s1 + $0x710] sm:$0xff] }
 0x537   :  { %950 = vmatmul.f32.vlgmr.msra.gmra.mxu0 %v933_v21  ;;  %v1723_v21 = vld [vmem:[%s3635_s1 + $0x658] sm:$0xff] }
 0x538   :  { %1105 = vmatpush.msra.mxu2 %v1723_v21  ;;  %v1713_v21 = vld [vmem:[%s3635_s1 + $0x608] sm:$0xff] }
 0x5b4   :  { %v951_v58 = vpop.f32.mrf.mxu0 }
 0x5b5   :  { %v954_v60 = vperm.slane %v951_v58, 0  ;;  %v1755_v58 = vld [vmem:[%s3635_s1 + $0x758] sm:$0xff] }
 0x5b6   :  { %1163 = vmatpush.msrb.mxu0 %v1755_v58  ;;  %v1745_v58 = vld [vmem:[%s3635_s1 + $0x708] sm:$0xff] }
 0x5b7   :  { %v3075_v26 = vsub.f32 %v921_v1, %v954_v60  ;;  %v3077_v62 = vsub.f32 %v922_v43, %v954_v60  ;;  %v3079_v27 = vsub.f32 %v923_v3, %v954_v60  ;;  %v3081_v4 = vsub.f32 %v924_v54, %v954_v60  ;;  %v1742_v1 = vld [vmem:[%s3635_s1 + $0x6f0] sm:$0xff]  ;;  %v1741_v3 = vld [vmem:[%s3635_s1 + $0x6e8] sm:$0xff]  ;;  %v1739_v54 = vld [vmem:[%s3635_s1 + $0x6d8] sm:$0xff] }
 0x5b8   :  { %1131 = vmatpush.msra.mxu3 %v1742_v1  ;;  %v1736_v60 = vld [vmem:[%s3635_s1 + $0x6c0] sm:$0xff]  ;;  %v1717_v1 = vld [vmem:[%s3635_s1 + $0x628] sm:$0xff] }
 0x5b9   :  { %v959_v8 = vmul.f32 %v3075_v26, %v3075_v26  ;;  %v960_v11 = vmul.f32 %v3077_v62, %v3077_v62  ;;  %v961_v13 = vmul.f32 %v3079_v27, %v3079_v27  ;;  %v962_v31 = vmul.f32 %v3081_v4, %v3081_v4 }
 0x5ba   :  { %1132 = vmatpush.msra.mxu3 %v1741_v3  ;;  %v1731_v3 = vld [vmem:[%s3635_s1 + $0x698] sm:$0xff] }
 0x5bb   :  { %v963_v17 = vadd.f32 %v960_v11, %v959_v8  ;;  %v1722_v8 = vld [vmem:[%s3635_s1 + $0x650] sm:$0xff] }
 0x5bc   :  { %1133 = vmatpush.msra.mxu3 %v1740_v59  ;;  %v1754_v11 = vld [vmem:[%s3635_s1 + $0x750] sm:$0xff]  ;;  %1106 = vmatpush.msra.mxu2 %v1722_v8  ;;  %v1716_v59 = vld [vmem:[%s3635_s1 + $0x620] sm:$0xff] }
 0x5bd   :  { %v964_v22 = vadd.f32 %v963_v17, %v961_v13  ;;  %1164 = vmatpush.msrb.mxu0 %v1754_v11  ;;  %v1735_v13 = vld [vmem:[%s3635_s1 + $0x6b8] sm:$0xff]  ;;  %v1721_v17 = vld [vmem:[%s3635_s1 + $0x648] sm:$0xff]  ;;  %v1744_v8 = vld [vmem:[%s3635_s1 + $0x700] sm:$0xff] }
 0x5be   :  { %1134 = vmatpush.msra.mxu3 %v1739_v54  ;;  %1107 = vmatpush.msra.mxu2 %v1721_v17  ;;  %v1715_v54 = vld [vmem:[%s3635_s1 + $0x618] sm:$0xff] }
 0x5bf   :  { %v965_v25 = vadd.f32 %v964_v22, %v962_v31  ;;  %v1753_v31 = vld [vmem:[%s3635_s1 + $0x748] sm:$0xff]  ;;  %v1734_v22 = vld [vmem:[%s3635_s1 + $0x6b0] sm:$0xff] }
 0x5c0   :  { %1135 = vmatpush.msra.mxu3 %v1738_v52  ;;  %1165 = vmatpush.msrb.mxu0 %v1753_v31 }
 0x5c1   :  { %v966_v30 = vrot.slane %v965_v25, 4 }
 0x5c2   :  { %1136 = vmatpush.msra.mxu3 %v1737_v23 }
 0x5c3   :  { %v967_v37 = vadd.f32 %v966_v30, %v965_v25  ;;  %v1720_v25 = vld [vmem:[%s3635_s1 + $0x640] sm:$0xff] }
 0x5c4   :  { %1137 = vmatpush.msra.mxu3 %v1736_v60  ;;  %v1752_v30 = vld [vmem:[%s3635_s1 + $0x740] sm:$0xff]  ;;  %1108 = vmatpush.msra.mxu2 %v1720_v25 }
 0x5c5   :  { %v968_v40 = vrot.slane %v967_v37, 2  ;;  %1166 = vmatpush.msrb.mxu0 %v1752_v30  ;;  %v1712_v60 = vld [vmem:[%s3635_s1 + $0x600] sm:$0xff] }
 0x5c6   :  { %1138 = vmatpush.msra.mxu3 %v1735_v13 }
 0x5c7   :  { %v969_v42 = vadd.f32 %v968_v40, %v967_v37  ;;  %v1733_v37 = vld [vmem:[%s3635_s1 + $0x6a8] sm:$0xff]  ;;  %v1719_v40 = vld [vmem:[%s3635_s1 + $0x638] sm:$0xff] }
 0x5c8   :  { %1139 = vmatpush.msra.mxu3 %v1734_v22  ;;  %1109 = vmatpush.msra.mxu2 %v1719_v40 }
 0x5c9   :  { %v970_v43 = vrot.slane %v969_v42, 1 }
 0x5ca   :  { %1140 = vmatpush.msra.mxu3 %v1733_v37 }
 0x5cb   :  { %v971_v48 = vadd.f32 %v970_v43, %v969_v42  ;;  %v1751_v42 = vld [vmem:[%s3635_s1 + $0x738] sm:$0xff]  ;;  %v1718_v43 = vld [vmem:[%s3635_s1 + $0x630] sm:$0xff] }
 0x5cc   :  { %1167 = vmatpush.msrb.mxu0 %v1751_v42  ;;  %1110 = vmatpush.msra.mxu2 %v1718_v43 }
 0x5cd   :  { %988 = vmatmul.f32.vlgmr.msra.gmra.mxu1 %v971_v48  ;;  %v1732_v48 = vld [vmem:[%s3635_s1 + $0x6a0] sm:$0xff] }
 0x5ce   :  { %1141 = vmatpush.msra.mxu3 %v1732_v48  ;;  %1168 = vmatpush.msrb.mxu0 %v1750_v50  ;;  %v1792_v48 = vld [vmem:[%s3635_s1 + $0x878] sm:$0xff] }
 0x5cf   :  { %1111 = vmatpush.msra.mxu2 %v1717_v1  ;;  %v1808_v50 = vld [vmem:[%s3635_s1 + $0x8f8] sm:$0xff] }
 0x5d0   :  { %1142 = vmatpush.msra.mxu3 %v1731_v3  ;;  %1169 = vmatpush.msrb.mxu0 %v1749_v45 }
 0x5d1   :  { %1112 = vmatpush.msra.mxu2 %v1716_v59  ;;  %v1788_v59 = vld [vmem:[%s3635_s1 + $0x858] sm:$0xff] }
 0x5d2   :  { %1143 = vmatpush.msra.mxu3 %v1730_v57  ;;  %1170 = vmatpush.msrb.mxu0 %v1748_v63 }
 0x5d3   :  { %1113 = vmatpush.msra.mxu2 %v1715_v54  ;;  %v1786_v54 = vld [vmem:[%s3635_s1 + $0x848] sm:$0xff] }
 0x5d4   :  { %1144 = vmatpush.msra.mxu3 %v1729_v18  ;;  %1171 = vmatpush.msrb.mxu0 %v1747_v6 }
 0x5d5   :  { %1114 = vmatpush.msra.mxu2 %v1714_v53 }
 0x5d6   :  { %1145 = vmatpush.msra.mxu3 %v1728_v51  ;;  %1172 = vmatpush.msrb.mxu0 %v1746_v56 }
 0x5d7   :  { %1115 = vmatpush.msra.mxu2 %v1713_v21 }
 0x5d8   :  { %1173 = vmatpush.msrb.mxu0 %v1745_v58  ;;  %1328 = vmatpush.msrb.mxu3 %v1808_v50  ;;  %v3397_v50 = vld [vmem:[%s3633_s5 + $0x70] sm:$0xff] }
 0x5d9   :  { %1116 = vmatpush.msra.mxu2 %v1712_v60 }
 0x5da   :  { %1174 = vmatpush.msrb.mxu0 %v1744_v8 }
 0x5db   :  { %1299 = vmatpush.msrb.mxu2 %v1792_v48  ;;  %v1799_v48 = vld [vmem:[%s3635_s1 + $0x8b0] sm:$0xff] }
 0x5dc   :  { %1370 = vmatpush.msra.mxu0 %v2674_v9  ;;  %v1710_v9 = vld [vmem:[%s3637_s3 + $0x2] sm:$0x1] }
 0x5de   :  { %1371 = vmatpush.msra.mxu0 %v2680_v15 }
 0x5e0   :  { %1372 = vmatpush.msra.mxu0 %v2686_v19 }
 0x5e2   :  { %1373 = vmatpush.msra.mxu0 %v2692_v32 }
 0x5e4   :  { %1374 = vmatpush.msra.mxu0 %v2698_v35  ;;  %v1822_v35 = vld [vmem:[%s3636_s4 + $0x2] ss:$0 sm:$0xff] }
 0x5e6   :  { %1375 = vmatpush.msra.mxu0 %v2707_v29 }
 0x5e8   :  { %1376 = vmatpush.msra.mxu0 %v2713_v36 }
 0x5ea   :  { %1377 = vmatpush.msra.mxu0 %v2719_v38 }
 0x5ec   :  { %1378 = vmatpush.msra.mxu0 %v2728_v41  ;;  %v1791_v41 = vld [vmem:[%s3635_s1 + $0x870] sm:$0xff] }
 0x5ed   :  { %1300 = vmatpush.msrb.mxu2 %v1791_v41  ;;  %v1774_v41 = vld [vmem:[%s3635_s1 + $0x7e8] sm:$0xff] }
 0x5ee   :  { %1379 = vmatpush.msra.mxu0 %v2738_v2 }
 0x5f0   :  { %1380 = vmatpush.msra.mxu0 %v2750_v55 }
 0x5f2   :  { %1381 = vmatpush.msra.mxu0 %v2790_v16 }
 0x5f4   :  { %1382 = vmatpush.msra.mxu0 %v2806_v61  ;;  %v1787_v61 = vld [vmem:[%s3635_s1 + $0x850] sm:$0xff] }
 0x5f6   :  { %1383 = vmatpush.msra.mxu0 %v2824_v33 }
 0x5f8   :  { %1384 = vmatpush.msra.mxu0 %v2840_v28 }
 0x5fa   :  { %1385 = vmatpush.msra.mxu0 %v2848_v39 }
 0x64a   :  { %v989_v52 = vpop.f32.mrf.mxu1 }
 0x64b   :  { %v990_v23 = vadd.f32 1e-05, %v989_v52  ;;  %v1785_v52 = vld [vmem:[%s3635_s1 + $0x840] sm:$0xff] }
 0x64d   :  { %1829 = vrsqrt.f32 %v990_v23  ;;  %vm998_vm9 = vweird.f32 %v990_v23 }
 0x653   :  { %v1830_v11 = vpop.eup %1829 }
 0x654   :  { %v993_v13 = vmul.f32 %v1830_v11, %v990_v23  ;;  %vm999_vm8 = vweird.f32 %v1830_v11 }
 0x655   :  { %vm1000_vm10 = vmor %vm998_vm9, %vm999_vm8 }
 0x656   :  { %v994_v17 = vmul.f32 %v1830_v11, %v993_v13 }
 0x658   :  { %v995_v31 = vmul.f32 0.5, %v994_v17  ;;  %v1784_v17 = vld [vmem:[%s3635_s1 + $0x838] sm:$0xff] }
 0x65a   :  { %v996_v22 = vsub.f32 1.5, %v995_v31  ;;  %v1806_v31 = vld [vmem:[%s3635_s1 + $0x8e8] sm:$0xff] }
 0x65c   :  { %v997_v25 = vmul.f32 %v1830_v11, %v996_v22  ;;  %v1783_v22 = vld [vmem:[%s3635_s1 + $0x830] sm:$0xff] }
 0x65e   :  { %v1001_v15 = vsel %vm1000_vm10, %v1830_v11, %v997_v25  ;;  %v1805_v25 = vld [vmem:[%s3635_s1 + $0x8e0] sm:$0xff] }
 0x65f   :  { %v1004_v19 = vmul.f32 %v1710_v9, %v1001_v15  ;;  %v1782_v9 = vld [vmem:[%s3635_s1 + $0x828] sm:$0xff]  ;;  %v1804_v15 = vld [vmem:[%s3635_s1 + $0x8d8] sm:$0xff] }
 0x661   :  { %v1005_v32 = vperm.slane %v1004_v19, 0  ;;  %v1781_v19 = vld [vmem:[%s3635_s1 + $0x820] sm:$0xff] }
 0x663   :  { %v1007_v30 = vmul.f32 %v1005_v32, %v3077_v62  ;;  %v1009_v37 = vmul.f32 %v1005_v32, %v3081_v4  ;;  %v1006_v29 = vmul.f32 %v1005_v32, %v3075_v26  ;;  %v1008_v40 = vmul.f32 %v1005_v32, %v3079_v27  ;;  %v1790_v4 = vld [vmem:[%s3635_s1 + $0x868] sm:$0xff]  ;;  %v1803_v32 = vld [vmem:[%s3635_s1 + $0x8d0] sm:$0xff] }
 0x664   :  { %1301 = vmatpush.msrb.mxu2 %v1790_v4  ;;  %v1772_v4 = vld [vmem:[%s3635_s1 + $0x7d8] sm:$0xff] }
 0x665   :  { %v1015_v36 = vadd.f32 %v1822_v35, %v1006_v29  ;;  %v1018_v42 = vadd.f32 %v1822_v35, %v1009_v37  ;;  %v1016_v38 = vadd.f32 %v1822_v35, %v1007_v30  ;;  %v1017_v43 = vadd.f32 %v1822_v35, %v1008_v40  ;;  %v1780_v35 = vld [vmem:[%s3635_s1 + $0x818] sm:$0xff]  ;;  %v1802_v30 = vld [vmem:[%s3635_s1 + $0x8c8] sm:$0xff]  ;;  %v1779_v37 = vld [vmem:[%s3635_s1 + $0x810] sm:$0xff] }
 0x666   :  { %v1801_v29 = vld [vmem:[%s3635_s1 + $0x8c0] sm:$0xff]  ;;  %v1778_v40 = vld [vmem:[%s3635_s1 + $0x808] sm:$0xff] }
 0x667   :  { %v1019_v26 = vadd.f32 %v2756_v20, %v1015_v36  ;;  %v1022_v62 = vadd.f32 %v2764_v47, %v1018_v42  ;;  %v1020_v2 = vadd.f32 %v2772_v10, %v1016_v38  ;;  %v1021_v27 = vadd.f32 %v2778_v12, %v1017_v43  ;;  %v1807_v10 = vld [vmem:[%s3635_s1 + $0x8f0] sm:$0xff]  ;;  %v1789_v12 = vld [vmem:[%s3635_s1 + $0x860] sm:$0xff]  ;;  %v1776_v36 = vld [vmem:[%s3635_s1 + $0x7f8] sm:$0xff] }
 0x668   :  { %1329 = vmatpush.msrb.mxu3 %v1807_v10  ;;  %1302 = vmatpush.msrb.mxu2 %v1789_v12  ;;  %v1800_v42 = vld [vmem:[%s3635_s1 + $0x8b8] sm:$0xff]  ;;  %v1777_v38 = vld [vmem:[%s3635_s1 + $0x800] sm:$0xff]  ;;  %v1775_v43 = vld [vmem:[%s3635_s1 + $0x7f0] sm:$0xff] }
 0x669   :  { %v1023_v55 = vrot.slane %v1019_v26, 7  ;;  %v1035_v1 = vrot.slane %v1019_v26, 1  ;;  %1146 = vmatmul.f32.vlgmr.msra.gmra.mxu3 %v1019_v26  ;;  %v1026_v20 = vrot.slane %v1022_v62, 7  ;;  %v1036_v47 = vrot.slane %v1020_v2, 1  ;;  %1270 = vmatpush.msrb.mxu1 %v1776_v36  ;;  %v1798_v26 = vld [vmem:[%s3635_s1 + $0x8a8] sm:$0xff]  ;;  %v3421_v12 = vld [vmem:[%s3633_s5 + $0x60] sm:$0xff] }
 0x66a   :  { %v1024_v63 = vrot.slane %v1020_v2, 7  ;;  %v1037_v18 = vrot.slane %v1021_v27, 1  ;;  %1303 = vmatpush.msrb.mxu2 %v1788_v59  ;;  %v1025_v56 = vrot.slane %v1021_v27, 7  ;;  %v1038_v23 = vrot.slane %v1022_v62, 1  ;;  %1330 = vmatpush.msrb.mxu3 %v1806_v31  ;;  %v1770_v10 = vld [vmem:[%s3635_s1 + $0x7c8] sm:$0xff]  ;;  %v1768_v59 = vld [vmem:[%s3635_s1 + $0x7b8] sm:$0xff] }
 0x66b   :  { %v1030_v16 = vsel %vm155_vm3, %v1026_v20, %v1023_v55  ;;  %v1041_v3 = vsel %vm168_vm4, %v1035_v1, %v1036_v47  ;;  %1271 = vmatpush.msrb.mxu1 %v1775_v43  ;;  %v1761_v31 = vld [vmem:[%s3635_s1 + $0x780] sm:$0xff] }
 0x66c   :  { %v1031_v45 = vmul.f32 %v3028_v0, %v1030_v16  ;;  %v1043_v57 = vmul.f32 %v3001_v24, %v1041_v3  ;;  %v1029_v6 = vsel %vm155_vm3, %v1023_v55, %v1024_v63  ;;  %v1040_v51 = vsel %vm168_vm4, %v1036_v47, %v1037_v18  ;;  %1304 = vmatpush.msrb.mxu2 %v1787_v61  ;;  %v1796_v55 = vld [vmem:[%s3635_s1 + $0x898] sm:$0xff]  ;;  %v1795_v47 = vld [vmem:[%s3635_s1 + $0x890] sm:$0xff]  ;;  %v1794_v16 = vld [vmem:[%s3635_s1 + $0x888] sm:$0xff] }
 0x66d   :  { %v1032_v33 = vmul.f32 %v3047_v46, %v1029_v6  ;;  %v1044_v53 = vmul.f32 %v3013_v34, %v1040_v51  ;;  %v1028_v21 = vsel %vm155_vm3, %v1024_v63, %v1025_v56  ;;  %v1039_v58 = vsel %vm168_vm4, %v1037_v18, %v1038_v23  ;;  %1331 = vmatpush.msrb.mxu3 %v1805_v25  ;;  %v1769_v3 = vld [vmem:[%s3635_s1 + $0x7c0] sm:$0xff]  ;;  %v3445_v63 = vld [vmem:[%s3633_s5 + $0x50] sm:$0xff]  ;;  %v3451_v18 = vld [vmem:[%s3633_s5 + $0x48] sm:$0xff] }
 0x66e   :  { %1117 = vmatmul.f32.vlgmr.msra.gmra.mxu2 %v1031_v45  ;;  %1175 = vmatmul.f32.vlgmr.msrb.gmra.mxu0 %v1043_v57  ;;  %v1033_v28 = vmul.f32 %v3061_v49, %v1028_v21  ;;  %v1045_v60 = vmul.f32 %v3034_v44, %v1039_v58  ;;  %v1027_v39 = vsel %vm155_vm3, %v1025_v56, %v1026_v20  ;;  %v1771_v20 = vld [vmem:[%s3635_s1 + $0x7d0] sm:$0xff]  ;;  %v3433_v45 = vld [vmem:[%s3633_s5 + $0x58] sm:$0xff]  ;;  %v1793_v57 = vld [vmem:[%s3635_s1 + $0x880] sm:$0xff] }
 0x66f   :  { %1305 = vmatpush.msrb.mxu2 %v1786_v54  ;;  %v1042_v8 = vsel %vm168_vm4, %v1038_v23, %v1035_v1  ;;  %v1034_v11 = vmul.f32 %v3069_v14, %v1027_v39  ;;  %1332 = vmatpush.msrb.mxu3 %v1804_v15  ;;  %v3406_v1 = vld [vmem:[%s3633_s5 + $0x68] sm:$0xff]  ;;  %v1767_v61 = vld [vmem:[%s3635_s1 + $0x7b0] sm:$0xff]  ;;  %v3464_v6 = vld [vmem:[%s3633_s5 + $0x40] sm:$0xff] }
 0x670   :  { %v1046_v13 = vmul.f32 %v3053_v5, %v1042_v8  ;;  %1272 = vmatpush.msrb.mxu1 %v1774_v41  ;;  %v1766_v54 = vld [vmem:[%s3635_s1 + $0x7a8] sm:$0xff]  ;;  %v1764_v23 = vld [vmem:[%s3635_s1 + $0x798] sm:$0xff]  ;;  %v3489_v21 = vld [vmem:[%s3633_s5 + $0x30] sm:$0xff] }
 0x671   :  { %1149 = vmatmul.f32.gmra.mxu3 %v1020_v2  ;;  %1306 = vmatpush.msrb.mxu2 %v1785_v52  ;;  %v3385_v2 = vld [vmem:[%s3633_s5 + $0x78] sm:$0xff]  ;;  %v3471_v52 = vld [vmem:[%s3640_s2 + $0x4] ss:$0 sm:$0xff]  ;;  %v3500_v39 = vld [vmem:[%s3633_s5 + $0x28] sm:$0xff] }
 0x672   :  { %1333 = vmatpush.msrb.mxu3 %v1803_v32  ;;  %v3529_v15 = vld [vmem:[%s3633_s5 + $0x10] sm:$0xff] }
 0x673   :  { %1307 = vmatpush.msrb.mxu2 %v1784_v17 }
 0x674   :  { %1334 = vmatpush.msrb.mxu3 %v1802_v30  ;;  %v1877_v30 = vld [vmem:[%s3633_s5 + $0x8] sm:$0xff] }
 0x675   :  { %1308 = vmatpush.msrb.mxu2 %v1783_v22  ;;  %v3520_v22 = vld [vmem:[%s3633_s5 + $0x18] sm:$0xff] }
 0x676   :  { %1120 = vmatmul.f32.gmra.mxu2 %v1032_v33  ;;  %1178 = vmatmul.f32.gmra.mxu0 %v1044_v53  ;;  %v1765_v33 = vld [vmem:[%s3635_s1 + $0x7a0] sm:$0xff]  ;;  %v3479_v53 = vld [vmem:[%s3633_s5 + $0x38] sm:$0xff] }
 0x677   :  { %1309 = vmatpush.msrb.mxu2 %v1782_v9  ;;  %1335 = vmatpush.msrb.mxu3 %v1801_v29  ;;  %v1878_v29 = vld [vmem:[%s3633_s5] sm:$0xff] }
 0x679   :  { %1152 = vmatmul.f32.gmra.mxu3 %v1021_v27  ;;  %1310 = vmatpush.msrb.mxu2 %v1781_v19  ;;  %v1797_v27 = vld [vmem:[%s3635_s1 + $0x8a0] sm:$0xff] }
 0x67a   :  { %1336 = vmatpush.msrb.mxu3 %v1800_v42 }
 0x67b   :  { %1311 = vmatpush.msrb.mxu2 %v1780_v35 }
 0x67c   :  { %1337 = vmatpush.msrb.mxu3 %v1799_v48 }
 0x67d   :  { %1312 = vmatpush.msrb.mxu2 %v1779_v37 }
 0x67e   :  { %1123 = vmatmul.f32.gmra.mxu2 %v1033_v28  ;;  %1181 = vmatmul.f32.gmra.mxu0 %v1045_v60  ;;  %v1763_v60 = vld [vmem:[%s3635_s1 + $0x790] sm:$0xff] }
 0x67f   :  { %1313 = vmatpush.msrb.mxu2 %v1778_v40  ;;  %1338 = vmatpush.msrb.mxu3 %v1798_v26 }
 0x681   :  { %1155 = vmatmul.f32.gmra.mxu3 %v1022_v62  ;;  %1314 = vmatpush.msrb.mxu2 %v1777_v38  ;;  %v1773_v62 = vld [vmem:[%s3635_s1 + $0x7e0] sm:$0xff] }
 0x682   :  { %1273 = vmatpush.msrb.mxu1 %v1773_v62  ;;  %1339 = vmatpush.msrb.mxu3 %v1797_v27 }
 0x683   :  { %1468 = vmatpush.msra.mxu2 %v3385_v2 }
 0x684   :  { %1274 = vmatpush.msrb.mxu1 %v1772_v4  ;;  %1340 = vmatpush.msrb.mxu3 %v1796_v55 }
 0x685   :  { %1469 = vmatpush.msra.mxu2 %v3397_v50 }
 0x686   :  { %1126 = vmatmul.f32.gmra.mxu2 %v1034_v11  ;;  %1184 = vmatmul.f32.gmra.mxu0 %v1046_v13  ;;  %v1762_v11 = vld [vmem:[%s3635_s1 + $0x788] sm:$0xff]  ;;  %v3510_v13 = vld [vmem:[%s3633_s5 + $0x20] sm:$0xff] }
 0x687   :  { %1470 = vmatpush.msra.mxu2 %v3406_v1  ;;  %1275 = vmatpush.msrb.mxu1 %v1771_v20 }
 0x688   :  { %1341 = vmatpush.msrb.mxu3 %v1795_v47 }
 0x689   :  { %1471 = vmatpush.msra.mxu2 %v3421_v12  ;;  %1276 = vmatpush.msrb.mxu1 %v1770_v10 }
 0x68a   :  { %1342 = vmatpush.msrb.mxu3 %v1794_v16 }
 0x68b   :  { %1472 = vmatpush.msra.mxu2 %v3433_v45  ;;  %1277 = vmatpush.msrb.mxu1 %v1769_v3 }
 0x68c   :  { %1343 = vmatpush.msrb.mxu3 %v1793_v57 }
 0x68d   :  { %1473 = vmatpush.msra.mxu2 %v3445_v63  ;;  %1278 = vmatpush.msrb.mxu1 %v1768_v59 }
 0x68e   :  { %1506 = vmatpush.msra.mxu3 %v3385_v2 }
 0x68f   :  { %1474 = vmatpush.msra.mxu2 %v3451_v18  ;;  %1279 = vmatpush.msrb.mxu1 %v1767_v61 }
 0x690   :  { %1507 = vmatpush.msra.mxu3 %v3397_v50 }
 0x691   :  { %1475 = vmatpush.msra.mxu2 %v3464_v6  ;;  %1280 = vmatpush.msrb.mxu1 %v1766_v54 }
 0x692   :  { %1508 = vmatpush.msra.mxu3 %v3406_v1 }
 0x693   :  { %1476 = vmatpush.msra.mxu2 %v3479_v53  ;;  %1281 = vmatpush.msrb.mxu1 %v1765_v33 }
 0x694   :  { %1509 = vmatpush.msra.mxu3 %v3421_v12 }
 0x695   :  { %1477 = vmatpush.msra.mxu2 %v3489_v21  ;;  %1282 = vmatpush.msrb.mxu1 %v1764_v23 }
 0x696   :  { %1510 = vmatpush.msra.mxu3 %v3433_v45 }
 0x697   :  { %1478 = vmatpush.msra.mxu2 %v3500_v39  ;;  %1283 = vmatpush.msrb.mxu1 %v1763_v60 }
 0x698   :  { %1511 = vmatpush.msra.mxu3 %v3445_v63 }
 0x699   :  { %1479 = vmatpush.msra.mxu2 %v3510_v13  ;;  %1284 = vmatpush.msrb.mxu1 %v1762_v11 }
 0x69a   :  { %1512 = vmatpush.msra.mxu3 %v3451_v18 }
 0x69b   :  { %1480 = vmatpush.msra.mxu2 %v3520_v22  ;;  %1285 = vmatpush.msrb.mxu1 %v1761_v31 }
 0x69c   :  { %1513 = vmatpush.msra.mxu3 %v3464_v6 }
 0x69d   :  { %1481 = vmatpush.msra.mxu2 %v3529_v15  ;;  %1408 = vmatpush.msra.mxu1 %v3385_v2 }
 0x69e   :  { %1514 = vmatpush.msra.mxu3 %v3479_v53 }
 0x69f   :  { %1482 = vmatpush.msra.mxu2 %v1877_v30  ;;  %1409 = vmatpush.msra.mxu1 %v3397_v50 }
 0x6a0   :  { %1515 = vmatpush.msra.mxu3 %v3489_v21 }
 0x6a1   :  { %1483 = vmatpush.msra.mxu2 %v1878_v29  ;;  %1410 = vmatpush.msra.mxu1 %v3406_v1 }
 0x6a2   :  { %1516 = vmatpush.msra.mxu3 %v3500_v39 }
 0x6a3   :  { %1411 = vmatpush.msra.mxu1 %v3421_v12 }
 0x6a4   :  { %1517 = vmatpush.msra.mxu3 %v3510_v13 }
 0x6a5   :  { %1412 = vmatpush.msra.mxu1 %v3433_v45 }
 0x6a6   :  { %1518 = vmatpush.msra.mxu3 %v3520_v22 }
 0x6a7   :  { %1413 = vmatpush.msra.mxu1 %v3445_v63 }
 0x6a8   :  { %1519 = vmatpush.msra.mxu3 %v3529_v15 }
 0x6a9   :  { %1414 = vmatpush.msra.mxu1 %v3451_v18 }
 0x6aa   :  { %1520 = vmatpush.msra.mxu3 %v1877_v30 }
 0x6ab   :  { %1415 = vmatpush.msra.mxu1 %v3464_v6 }
 0x6ac   :  { %1521 = vmatpush.msra.mxu3 %v1878_v29 }
 0x6ad   :  { %1416 = vmatpush.msra.mxu1 %v3479_v53 }
 0x6af   :  { %1417 = vmatpush.msra.mxu1 %v3489_v21 }
 0x6b1   :  { %1418 = vmatpush.msra.mxu1 %v3500_v39 }
 0x6b3   :  { %1419 = vmatpush.msra.mxu1 %v3510_v13 }
 0x6b5   :  { %1420 = vmatpush.msra.mxu1 %v3520_v22 }
 0x6b7   :  { %1421 = vmatpush.msra.mxu1 %v3529_v15 }
 0x6b9   :  { %1422 = vmatpush.msra.mxu1 %v1877_v30 }
 0x6bb   :  { %1423 = vmatpush.msra.mxu1 %v1878_v29 }
 0x6eb   :  { %v1176_v56 = vpop.f32.mrf.mxu0 }
 0x6ec   :  { %v1147_v51 = vpop.f32.mrf.mxu3 }
 0x6f1   :  { %v1118_v58 = vpop.f32.mrf.mxu2 }
 0x6f2   :  { %v1119_v28 = vadd.f32 %v3471_v52, %v1118_v58 }
 0x6f3   :  { %v1179_v19 = vpop.f32.mrf.mxu0 }
 0x6f4   :  { %v1148_v8 = vadd.f32 %v1147_v51, %v1119_v28  ;;  %v1150_v25 = vpop.f32.mrf.mxu3 }
 0x6f6   :  { %v1177_v17 = vadd.f32 %v1176_v56, %v1148_v8  ;;  %v1824_v8 = vld [vmem:[%s3640_s2 + $0x5] ss:$0 sm:$0xff] }
 0x6f8   :  { %v3524_v9 = vmax.f32 %v1177_v17, 0.0 }
 0x6f9   :  { %v1121_v32 = vpop.f32.mrf.mxu2 }
 0x6fa   :  { %v1122_v35 = vadd.f32 %v3471_v52, %v1121_v32  ;;  %1315 = vmatmul.f32.vlgmr.msrb.gmra.mxu2 %v3524_v9  ;;  %v1204_v43 = vrot.slane %v3524_v9, 1  ;;  %v1192_v57 = vrot.slane %v3524_v9, 7 }
 0x6fb   :  { %v1182_v26 = vpop.f32.mrf.mxu0 }
 0x6fc   :  { %v1151_v37 = vadd.f32 %v1150_v25, %v1122_v35  ;;  %v1153_v42 = vpop.f32.mrf.mxu3 }
 0x6fe   :  { %v1180_v40 = vadd.f32 %v1179_v19, %v1151_v37 }
 0x700   :  { %v3547_v36 = vmax.f32 %v1180_v40, 0.0 }
 0x701   :  { %v1124_v38 = vpop.f32.mrf.mxu2 }
 0x702   :  { %v1125_v48 = vadd.f32 %v3471_v52, %v1124_v38  ;;  %v1205_v41 = vrot.slane %v3547_v36, 1  ;;  %1318 = vmatmul.f32.gmra.mxu2 %v3547_v36  ;;  %v1193_v6 = vrot.slane %v3547_v36, 7 }
 0x703   :  { %v1185_v12 = vpop.f32.mrf.mxu0 }
 0x704   :  { %v1154_v62 = vadd.f32 %v1153_v42, %v1125_v48  ;;  %v1210_v2 = vsel %vm168_vm4, %v1204_v43, %v1205_v41  ;;  %v1156_v47 = vpop.f32.mrf.mxu3  ;;  %v1198_v51 = vsel %vm155_vm3, %v1192_v57, %v1193_v6 }
 0x705   :  { %v1212_v27 = vmul.f32 %v3001_v24, %v1210_v2  ;;  %v1201_v33 = vmul.f32 %v3047_v46, %v1198_v51 }
 0x706   :  { %v1183_v4 = vadd.f32 %v1182_v26, %v1154_v62 }
 0x707   :  { %1344 = vmatmul.f32.vlgmr.msrb.gmra.mxu3 %v1212_v27 }
 0x708   :  { %v1190_v50 = vmax.f32 %v1183_v4, 0.0 }
 0x709   :  { %v1127_v55 = vpop.f32.mrf.mxu2 }
 0x70a   :  { %v1128_v1 = vadd.f32 %v3471_v52, %v1127_v55  ;;  %1321 = vmatmul.f32.gmra.mxu2 %v1190_v50  ;;  %v1206_v20 = vrot.slane %v1190_v50, 1  ;;  %v1194_v56 = vrot.slane %v1190_v50, 7 }
 0x70c   :  { %v1157_v24 = vadd.f32 %v1156_v47, %v1128_v1  ;;  %v1209_v10 = vsel %vm168_vm4, %v1205_v41, %v1206_v20 }
 0x70d   :  { %v1213_v16 = vmul.f32 %v3013_v34, %v1209_v10 }
 0x70e   :  { %v1186_v3 = vadd.f32 %v1185_v12, %v1157_v24 }
 0x70f   :  { %1347 = vmatmul.f32.gmra.mxu3 %v1213_v16 }
 0x710   :  { %v1191_v45 = vmax.f32 %v1186_v3, 0.0 }
 0x712   :  { %v1195_v59 = vrot.slane %v1191_v45, 7  ;;  %1324 = vmatmul.f32.gmra.mxu2 %v1191_v45  ;;  %v1207_v63 = vrot.slane %v1191_v45, 1 }
 0x714   :  { %v1199_v18 = vsel %vm155_vm3, %v1195_v59, %v1192_v57  ;;  %v1208_v34 = vsel %vm168_vm4, %v1206_v20, %v1207_v63  ;;  %v1211_v52 = vsel %vm168_vm4, %v1207_v63, %v1204_v43  ;;  %v1196_v23 = vsel %vm155_vm3, %v1194_v56, %v1195_v59 }
 0x715   :  { %v1200_v61 = vmul.f32 %v3028_v0, %v1199_v18  ;;  %v1214_v54 = vmul.f32 %v3034_v44, %v1208_v34  ;;  %v1215_v53 = vmul.f32 %v3053_v5, %v1211_v52  ;;  %v1197_v0 = vsel %vm155_vm3, %v1193_v6, %v1194_v56 }
 0x716   :  { %v1202_v44 = vmul.f32 %v3061_v49, %v1197_v0  ;;  %v1203_v21 = vmul.f32 %v3069_v14, %v1196_v23 }
 0x717   :  { %1286 = vmatmul.f32.vlgmr.msrb.gmra.mxu1 %v1200_v61  ;;  %1350 = vmatmul.f32.gmra.mxu3 %v1214_v54 }
 0x71f   :  { %1289 = vmatmul.f32.gmra.mxu1 %v1201_v33  ;;  %1353 = vmatmul.f32.gmra.mxu3 %v1215_v53 }
 0x727   :  { %1292 = vmatmul.f32.gmra.mxu1 %v1202_v44 }
 0x72f   :  { %1295 = vmatmul.f32.gmra.mxu1 %v1203_v21 }
 0x77d   :  { %v1316_v58 = vpop.f32.mrf.mxu2 }
 0x785   :  { %v1319_v60 = vpop.f32.mrf.mxu2 }
 0x78a   :  { %v1345_v28 = vpop.f32.mrf.mxu3 }
 0x78d   :  { %v1322_v49 = vpop.f32.mrf.mxu2 }
 0x792   :  { %v1348_v5 = vpop.f32.mrf.mxu3 }
 0x794   :  { %v1287_v46 = vpop.f32.mrf.mxu1 }
 0x795   :  { %v1288_v13 = vadd.f32 %v1824_v8, %v1287_v46  ;;  %v1325_v37 = vpop.f32.mrf.mxu2 }
 0x797   :  { %v1317_v25 = vadd.f32 %v1316_v58, %v1288_v13 }
 0x799   :  { %v1346_v15 = vadd.f32 %v1345_v28, %v1317_v25  ;;  %v1810_v28 = vld [vmem:[%s3637_s3 + $0x3] sm:$0x1] }
 0x79a   :  { %v1351_v22 = vpop.f32.mrf.mxu3  ;;  %v1879_v25 = vld [vmem:[%s3634_s0] sm:$0xff] }
 0x79b   :  { %v1357_v29 = vmax.f32 %v1346_v15, 0.0 }
 0x79c   :  { %v1290_v39 = vpop.f32.mrf.mxu1 }
 0x79d   :  { %v1291_v11 = vadd.f32 %v1824_v8, %v1290_v39 }
 0x79f   :  { %v1320_v31 = vadd.f32 %v1319_v60, %v1291_v11 }
 0x7a1   :  { %v1349_v9 = vadd.f32 %v1348_v5, %v1320_v31  ;;  %v1815_v5 = vld [vmem:[%s3636_s4 + $0x3] ss:$0 sm:$0xff] }
 0x7a2   :  { %v1354_v42 = vpop.f32.mrf.mxu3 }
 0x7a3   :  { %v1358_v35 = vmax.f32 %v1349_v9, 0.0  ;;  %v1880_v9 = vld [vmem:[%s3634_s0 + $0x8] sm:$0xff] }
 0x7a4   :  { %v1293_v17 = vpop.f32.mrf.mxu1 }
 0x7a5   :  { %v1294_v7 = vadd.f32 %v1824_v8, %v1293_v17  ;;  %v1361_v38 = vadd.f32 %v1358_v35, %v1357_v29 }
 0x7a7   :  { %v1323_v14 = vadd.f32 %v1322_v49, %v1294_v7 }
 0x7a9   :  { %v1352_v19 = vadd.f32 %v1351_v22, %v1323_v14 }
 0x7ab   :  { %v1359_v40 = vmax.f32 %v1352_v19, 0.0  ;;  %v1881_v19 = vld [vmem:[%s3634_s0 + $0x10] sm:$0xff] }
 0x7ac   :  { %v1296_v32 = vpop.f32.mrf.mxu1 }
 0x7ad   :  { %v1297_v30 = vadd.f32 %v1824_v8, %v1296_v32  ;;  %v1362_v48 = vadd.f32 %v1361_v38, %v1359_v40 }
 0x7af   :  { %v1326_v36 = vadd.f32 %v1325_v37, %v1297_v30  ;;  %v1882_v30 = vld [vmem:[%s3634_s0 + $0x18] sm:$0xff] }
 0x7b1   :  { %v1355_v43 = vadd.f32 %v1354_v42, %v1326_v36 }
 0x7b3   :  { %v1360_v41 = vmax.f32 %v1355_v43, 0.0 }
 0x7b5   :  { %v1363_v26 = vadd.f32 %v1362_v48, %v1360_v41 }
 0x7b7   :  { %v1364_v62 = vrot.slane %v1363_v26, 4 }
 0x7b9   :  { %v1365_v2 = vadd.f32 %v1364_v62, %v1363_v26 }
 0x7bb   :  { %v1366_v27 = vrot.slane %v1365_v2, 2 }
 0x7bd   :  { %v1367_v4 = vadd.f32 %v1366_v27, %v1365_v2 }
 0x7bf   :  { %v1368_v50 = vrot.slane %v1367_v4, 1 }
 0x7c1   :  { %v1369_v55 = vadd.f32 %v1368_v50, %v1367_v4 }
 0x7c3   :  { %1386 = vmatmul.f32.vlgmr.msra.gmra.mxu0 %v1369_v55 }
 0x840   :  { %v1387_v1 = vpop.f32.mrf.mxu0 }
 0x841   :  { %v1390_v20 = vperm.slane %v1387_v1, 0 }
 0x843   :  { %v1391_v47 = vsub.f32 %v1357_v29, %v1390_v20  ;;  %v1392_v24 = vsub.f32 %v1358_v35, %v1390_v20  ;;  %v1393_v10 = vsub.f32 %v1359_v40, %v1390_v20  ;;  %v1394_v12 = vsub.f32 %v1360_v41, %v1390_v20 }
 0x845   :  { %v1395_v16 = vmul.f32 %v1391_v47, %v1391_v47  ;;  %v1396_v3 = vmul.f32 %v1392_v24, %v1392_v24  ;;  %v1397_v45 = vmul.f32 %v1393_v10, %v1393_v10  ;;  %v1398_v59 = vmul.f32 %v1394_v12, %v1394_v12 }
 0x847   :  { %v1399_v57 = vadd.f32 %v1396_v3, %v1395_v16 }
 0x849   :  { %v1400_v63 = vadd.f32 %v1399_v57, %v1397_v45 }
 0x84b   :  { %v1401_v18 = vadd.f32 %v1400_v63, %v1398_v59 }
 0x84d   :  { %v1402_v34 = vrot.slane %v1401_v18, 4 }
 0x84f   :  { %v1403_v61 = vadd.f32 %v1402_v34, %v1401_v18 }
 0x851   :  { %v1404_v54 = vrot.slane %v1403_v61, 2 }
 0x853   :  { %v1405_v6 = vadd.f32 %v1404_v54, %v1403_v61 }
 0x855   :  { %v1406_v51 = vrot.slane %v1405_v6, 1 }
 0x857   :  { %v1407_v52 = vadd.f32 %v1406_v51, %v1405_v6 }
 0x859   :  { %1424 = vmatmul.f32.vlgmr.msra.gmra.mxu1 %v1407_v52 }
 0x8d6   :  { %v1425_v33 = vpop.f32.mrf.mxu1 }
 0x8d7   :  { %v1426_v53 = vadd.f32 1e-05, %v1425_v33 }
 0x8d9   :  { %1831 = vrsqrt.f32 %v1426_v53  ;;  %vm1434_vm12 = vweird.f32 %v1426_v53 }
 0x8df   :  { %v1832_v56 = vpop.eup %1831 }
 0x8e0   :  { %v1429_v0 = vmul.f32 %v1832_v56, %v1426_v53  ;;  %vm1435_vm11 = vweird.f32 %v1832_v56  ;;  %v1812_v53 = vld [vmem:[%s3637_s3 + $0x4] sm:$0x1] }
 0x8e1   :  { %vm1436_vm13 = vmor %vm1434_vm12, %vm1435_vm11 }
 0x8e2   :  { %v1430_v44 = vmul.f32 %v1832_v56, %v1429_v0 }
 0x8e4   :  { %v1431_v23 = vmul.f32 0.5, %v1430_v44  ;;  %v1816_v44 = vld [vmem:[%s3636_s4 + $0x4] ss:$0 sm:$0xff] }
 0x8e6   :  { %v1432_v21 = vsub.f32 1.5, %v1431_v23 }
 0x8e8   :  { %v1433_v58 = vmul.f32 %v1832_v56, %v1432_v21 }
 0x8ea   :  { %v1437_v46 = vsel %vm1436_vm13, %v1832_v56, %v1433_v58 }
 0x8eb   :  { %v1440_v60 = vmul.f32 %v1810_v28, %v1437_v46 }
 0x8ed   :  { %v1441_v39 = vperm.slane %v1440_v60, 0 }
 0x8ef   :  { %v1442_v8 = vmul.f32 %v1441_v39, %v1391_v47  ;;  %v1443_v11 = vmul.f32 %v1441_v39, %v1392_v24  ;;  %v1444_v13 = vmul.f32 %v1441_v39, %v1393_v10  ;;  %v1445_v49 = vmul.f32 %v1441_v39, %v1394_v12 }
 0x8f1   :  { %v1451_v17 = vadd.f32 %v1815_v5, %v1442_v8  ;;  %v1452_v31 = vadd.f32 %v1815_v5, %v1443_v11  ;;  %v1453_v7 = vadd.f32 %v1815_v5, %v1444_v13  ;;  %v1454_v22 = vadd.f32 %v1815_v5, %v1445_v49 }
 0x8f3   :  { %v1455_v14 = vadd.f32 %v1879_v25, %v1451_v17  ;;  %v1456_v15 = vadd.f32 %v1880_v9, %v1452_v31  ;;  %v1457_v32 = vadd.f32 %v1881_v19, %v1453_v7  ;;  %v1458_v37 = vadd.f32 %v1882_v30, %v1454_v22 }
 0x8f5   :  { %v1459_v35 = vadd.f32 %v1456_v15, %v1455_v14 }
 0x8f7   :  { %v1460_v29 = vadd.f32 %v1459_v35, %v1457_v32 }
 0x8f9   :  { %v1461_v40 = vadd.f32 %v1460_v29, %v1458_v37 }
 0x8fb   :  { %v1462_v36 = vrot.slane %v1461_v40, 4 }
 0x8fd   :  { %v1463_v42 = vadd.f32 %v1462_v36, %v1461_v40 }
 0x8ff   :  { %v1464_v38 = vrot.slane %v1463_v42, 2 }
 0x901   :  { %v1465_v43 = vadd.f32 %v1464_v38, %v1463_v42 }
 0x903   :  { %v1466_v48 = vrot.slane %v1465_v43, 1 }
 0x905   :  { %v1467_v41 = vadd.f32 %v1466_v48, %v1465_v43 }
 0x907   :  { %1484 = vmatmul.f32.vlgmr.msra.gmra.mxu2 %v1467_v41 }
 0x98a   :  { %v1485_v26 = vpop.f32.mrf.mxu2 }
 0x98b   :  { %v1488_v62 = vperm.slane %v1485_v26, 0 }
 0x98d   :  { %v1489_v2 = vsub.f32 %v1455_v14, %v1488_v62  ;;  %v1490_v27 = vsub.f32 %v1456_v15, %v1488_v62  ;;  %v1491_v4 = vsub.f32 %v1457_v32, %v1488_v62  ;;  %v1492_v50 = vsub.f32 %v1458_v37, %v1488_v62 }
 0x98f   :  { %v1493_v55 = vmul.f32 %v1489_v2, %v1489_v2  ;;  %v1494_v1 = vmul.f32 %v1490_v27, %v1490_v27  ;;  %v1495_v20 = vmul.f32 %v1491_v4, %v1491_v4  ;;  %v1496_v24 = vmul.f32 %v1492_v50, %v1492_v50 }
 0x991   :  { %v1497_v47 = vadd.f32 %v1494_v1, %v1493_v55 }
 0x993   :  { %v1498_v10 = vadd.f32 %v1497_v47, %v1495_v20 }
 0x995   :  { %v1499_v12 = vadd.f32 %v1498_v10, %v1496_v24 }
 0x997   :  { %v1500_v16 = vrot.slane %v1499_v12, 4 }
 0x999   :  { %v1501_v3 = vadd.f32 %v1500_v16, %v1499_v12 }
 0x99b   :  { %v1502_v45 = vrot.slane %v1501_v3, 2 }
 0x99d   :  { %v1503_v57 = vadd.f32 %v1502_v45, %v1501_v3 }
 0x99f   :  { %v1504_v59 = vrot.slane %v1503_v57, 1 }
 0x9a1   :  { %v1505_v63 = vadd.f32 %v1504_v59, %v1503_v57 }
 0x9a3   :  { %1522 = vmatmul.f32.vlgmr.msra.gmra.mxu3 %v1505_v63 }
 0xa26   :  { %v1523_v18 = vpop.f32.mrf.mxu3 }
 0xa27   :  { %v1524_v34 = vadd.f32 1e-05, %v1523_v18 }
 0xa29   :  { %1833 = vrsqrt.f32 %v1524_v34  ;;  %vm1532_vm15 = vweird.f32 %v1524_v34 }
 0xa2f   :  { %v1834_v61 = vpop.eup %1833 }
 0xa30   :  { %v1527_v54 = vmul.f32 %v1834_v61, %v1524_v34  ;;  %vm1533_vm14 = vweird.f32 %v1834_v61 }
 0xa31   :  { %vm1534_vm0 = vmor %vm1532_vm15, %vm1533_vm14 }
 0xa32   :  { %v1528_v6 = vmul.f32 %v1834_v61, %v1527_v54 }
 0xa34   :  { %v1529_v51 = vmul.f32 0.5, %v1528_v6 }
 0xa36   :  { %v1530_v52 = vsub.f32 1.5, %v1529_v51 }
 0xa38   :  { %v1531_v33 = vmul.f32 %v1834_v61, %v1530_v52 }
 0xa3a   :  { %v1535_v56 = vsel %vm1534_vm0, %v1834_v61, %v1531_v33 }
 0xa3b   :  { %v1538_v0 = vmul.f32 %v1812_v53, %v1535_v56 }
 0xa3d   :  { %v1539_v23 = vperm.slane %v1538_v0, 0 }
 0xa3f   :  { %v1540_v21 = vmul.f32 %v1539_v23, %v1489_v2  ;;  %v1541_v58 = vmul.f32 %v1539_v23, %v1490_v27  ;;  %v1542_v28 = vmul.f32 %v1539_v23, %v1491_v4  ;;  %v1543_v46 = vmul.f32 %v1539_v23, %v1492_v50 }
 0xa41   :  { %v1549_v60 = vadd.f32 %v1816_v44, %v1540_v21  ;;  %v1550_v5 = vadd.f32 %v1816_v44, %v1541_v58  ;;  %v1551_v39 = vadd.f32 %v1816_v44, %v1542_v28  ;;  %v1552_v8 = vadd.f32 %v1816_v44, %v1543_v46 }
 0xa43   :  { %1553 = vst [vmem:[%s3641_s8] sm:$0xff] %v1549_v60 }
 0xa44   :  { %1554 = vst [vmem:[%s3641_s8 + $0x8] sm:$0xff] %v1550_v5 }
 0xa45   :  { %1555 = vst [vmem:[%s3641_s8 + $0x10] sm:$0xff] %v1551_v39 }
 0xa46   :  { %1556 = vst [vmem:[%s3641_s8 + $0x18] sm:$0xff] %v1552_v8 }

</bundles_post_ra>
